<compile_context>
chip_gen: v7x
topology: tpu7x:2x2x1
jax: 0.10.0
libtpu: 0.0.40
codegen_flags: <defaults>
</compile_context>

<pallas_src>
import functools

import jax
import jax.numpy as jnp
from jax import lax
from jax.experimental import pallas as pl
from jax.experimental.pallas import tpu as pltpu

# norse default parameters (dt=0.001, LIFParameters(alpha=100, v_th=0.5), LIParameters())
DT = 0.001
TAU_SYN_INV = 200.0   # 1 / 5e-3
TAU_MEM_INV = 100.0   # 1 / 1e-2
V_LEAK = 0.0
V_RESET = 0.0
V_TH = 0.5


def _round_up(n, m):
    return ((n + m - 1) // m) * m


def snn_kernel(x_ref, w_in_ref, w_rec_ref, w_fc_ref, vo_ref,
               z_s, v_s, i_s, lv_s, li_s, xw_s, zrec_s,
               *, t_block, b_pad, unroll):
    # Initial state (s1 = so = None in the PyTorch forward) -> all zeros.
    @pl.when(pl.program_id(0) == 0)
    def _():
        z_s[...] = jnp.zeros_like(z_s)
        v_s[...] = jnp.zeros_like(v_s)
        i_s[...] = jnp.zeros_like(i_s)
        lv_s[...] = jnp.zeros_like(lv_s)
        li_s[...] = jnp.zeros_like(li_s)

    # --- Hoisted input projection: one MXU call for the whole time block. ---
    # x_ref: (t_block*B_pad, F), w_in_ref: (F, H)  ->  xw_s: (t_block*B_pad, H)
    xw_s[...] = jnp.dot(x_ref[...], w_in_ref[...],
                        preferred_element_type=jnp.float32)

    w_rec = w_rec_ref[...]   # (H, H) == w_rec.T, loop-invariant

    # --- LIFRecurrentCell (norse lif_step): only the recurrence stays in the loop ---
    def lif_step(tt, carry):
        z, v, i = carry
        row = pl.multiple_of(tt * b_pad, b_pad)
        v_dec = v + DT * TAU_MEM_INV * ((V_LEAK - v) + i)
        i_dec = i - DT * TAU_SYN_INV * i
        z_new = (v_dec - V_TH > 0).astype(jnp.float32)     # SuperSpike fwd = heaviside
        v_new = (1.0 - z_new) * v_dec + z_new * V_RESET
        i_new = i_dec + xw_s[pl.ds(row, b_pad), :] + jnp.dot(
            z, w_rec, preferred_element_type=jnp.float32)
        zrec_s[pl.ds(row, b_pad), :] = z_new                # record spikes for readout
        return (z_new, v_new, i_new)

    z, v, i = lax.fori_loop(0, t_block, lif_step,
                            (z_s[...], v_s[...], i_s[...]), unroll=unroll)
    z_s[...] = z
    v_s[...] = v
    i_s[...] = i

    # --- Hoisted fc_out readout: one MXU call for all timesteps of the block. ---
    # Output block buffer is reused as the y staging buffer (overwritten below).
    vo_ref[...] = jnp.dot(zrec_s[...], w_fc_ref[...],
                          preferred_element_type=jnp.float32)

    # --- LICell: pure-VPU elementwise scan over the block. ---
    def li_step(tt, carry):
        lv, li = carry
        row = pl.multiple_of(tt * b_pad, b_pad)
        y_t = vo_ref[pl.ds(row, b_pad), :]
        lv_new = lv + DT * TAU_MEM_INV * ((V_LEAK - lv) + li)
        li_new = (li - DT * TAU_SYN_INV * li) + y_t
        vo_ref[pl.ds(row, b_pad), :] = lv_new               # lane-dense store
        return (lv_new, li_new)

    lv, li = lax.fori_loop(0, t_block, li_step,
                           (lv_s[...], li_s[...]), unroll=unroll)
    lv_s[...] = lv
    li_s[...] = li


def snn_forward(x_flat, w_in, w_rec, w_fc, *, t_block=64):
    T, B, F = x_flat.shape
    H = w_in.shape[0]
    O = w_fc.shape[0]

    t_block = max(1, min(t_block, T))
    T_pad = _round_up(T, t_block)      # pad time so T_pad % t_block == 0 (zeros)
    B_pad = _round_up(B, 8)            # sublane multiple
    O_pad = _round_up(O, 128)          # lane-dense output
    unroll = min(8, t_block)

    # Skip the zero-pad copy when no padding is actually required.
    if T_pad != T or B_pad != B:
        x_p = jnp.zeros((T_pad, B_pad, F), jnp.float32).at[:T, :B, :].set(x_flat)
    else:
        x_p = x_flat.astype(jnp.float32)
    # Present x as a lane-dense 2-D slab (row-major collapse is free in XLA).
    x_2d = x_p.reshape(T_pad * B_pad, F)

    # Pre-transposed weights (no in-kernel transposes).
    w_in_t = w_in.T.astype(jnp.float32)                                   # (F, H)
    w_rec_t = w_rec.T.astype(jnp.float32)                                 # (H, H)
    w_fc_t = jnp.zeros((H, O_pad), jnp.float32).at[:, :O].set(w_fc.T)     # (H, O_pad)

    grid = (T_pad // t_block,)
    rows = t_block * B_pad

    # Cost estimate: two hoisted block matmuls + t_block recurrent matmuls per step.
    flops = 2 * T_pad * B_pad * (F * H + H * H + H * O_pad)
    bytes_accessed = 4 * (x_2d.size + w_in_t.size + w_rec_t.size + w_fc_t.size
                          + T_pad * B_pad * O_pad)

    # VMEM budget: double-buffered x/out blocks + weights + scratch, with headroom.
    vmem_est = 4 * (2 * rows * F + 2 * rows * O_pad            # x / out double buffers
                    + w_in_t.size + w_rec_t.size + w_fc_t.size
                    + 3 * B_pad * H + 2 * B_pad * O_pad        # state scratch
                    + 2 * rows * H)                            # xw / zrec scratch
    vmem_limit = min(48 * 1024 * 1024, max(16 * 1024 * 1024, 2 * vmem_est))

    out = pl.pallas_call(
        functools.partial(snn_kernel, t_block=t_block, b_pad=B_pad, unroll=unroll),
        out_shape=jax.ShapeDtypeStruct((T_pad * B_pad, O_pad), jnp.float32),
        grid_spec=pltpu.PrefetchScalarGridSpec(
            num_scalar_prefetch=0,
            grid=grid,
            in_specs=[
                pl.BlockSpec((rows, F), lambda t: (t, 0)),       # x time-block (2-D slab)
                pl.BlockSpec((F, H), lambda t: (0, 0)),          # w_in.T
                pl.BlockSpec((H, H), lambda t: (0, 0)),          # w_rec.T
                pl.BlockSpec((H, O_pad), lambda t: (0, 0)),      # w_fc.T (lane padded)
            ],
            out_specs=pl.BlockSpec((rows, O_pad), lambda t: (t, 0)),
            scratch_shapes=[
                pltpu.VMEM((B_pad, H), jnp.float32),       # z  (LIF spike state)
                pltpu.VMEM((B_pad, H), jnp.float32),       # v  (LIF membrane)
                pltpu.VMEM((B_pad, H), jnp.float32),       # i  (LIF current)
                pltpu.VMEM((B_pad, O_pad), jnp.float32),   # LI v
                pltpu.VMEM((B_pad, O_pad), jnp.float32),   # LI i
                pltpu.VMEM((rows, H), jnp.float32),        # hoisted x @ w_in.T
                pltpu.VMEM((rows, H), jnp.float32),        # recorded spikes per block
            ],
        ),
        compiler_params=pltpu.CompilerParams(
            dimension_semantics=("arbitrary",),    # sequential recurrence over time
            vmem_limit_bytes=int(vmem_limit),
        ),
        cost_estimate=pl.CostEstimate(
            flops=flops, transcendentals=0, bytes_accessed=bytes_accessed),
    )(x_2d, w_in_t, w_rec_t, w_fc_t)

    out = out.reshape(T_pad, B_pad, O_pad)
    # Note: padded timesteps (T_pad > T) evolve the carried state with zero input
    # inside the tail block; only the sliced voltages below are returned, so the
    # result is correct.  Do not reuse the final carried state without guarding.
    return out[:T, :B, :O]


def snn_reference(x_flat, w_in, w_rec, w_fc):
    """Pure-JAX reference of the norse SNN forward (for validation)."""
    T, B, F = x_flat.shape
    H = w_in.shape[0]
    O = w_fc.shape[0]
    state0 = (jnp.zeros((B, H)), jnp.zeros((B, H)), jnp.zeros((B, H)),
              jnp.zeros((B, O)), jnp.zeros((B, O)))

    def step(state, x_t):
        z, v, i, lv, li = state
        v_dec = v + DT * TAU_MEM_INV * ((V_LEAK - v) + i)
        i_dec = i - DT * TAU_SYN_INV * i
        z_new = (v_dec - V_TH > 0).astype(jnp.float32)
        v_new = (1.0 - z_new) * v_dec + z_new * V_RESET
        i_new = i_dec + x_t @ w_in.T + z @ w_rec.T
        y = z_new @ w_fc.T
        lv_new = lv + DT * TAU_MEM_INV * ((V_LEAK - lv) + li)
        li_new = (li - DT * TAU_SYN_INV * li) + y
        return (z_new, v_new, i_new, lv_new, li_new), lv_new

    _, vos = jax.lax.scan(step, state0, x_flat)
    return vos


if __name__ == "__main__":
    T, B, C, Hs, Ws = 8, 2, 4, 4, 4        # seq=8, batch=2, 4x4x4 input per step
    F = C * Hs * Ws                        # input_features = 64
    HID, OUT = 32, 8                       # hidden_features, output_features

    key = jax.random.PRNGKey(0)
    kx, k1, k2, k3 = jax.random.split(key, 4)
    x = jax.random.normal(kx, (T, B, C, Hs, Ws), dtype=jnp.float32)
    w_in = jax.random.normal(k1, (HID, F), dtype=jnp.float32) * (2.0 / F) ** 0.5
    w_rec = jax.random.normal(k2, (HID, HID), dtype=jnp.float32) * (2.0 / HID) ** 0.5
    w_fc = jax.random.normal(k3, (OUT, HID), dtype=jnp.float32) * (1.0 / HID) ** 0.5

    x_flat = x.reshape(T, B, F)            # == x[ts].view(-1, input_features) per step

    voltages = snn_forward(x_flat, w_in, w_rec, w_fc)
    voltages = jax.block_until_ready(voltages)

    ref = snn_reference(x_flat, w_in, w_rec, w_fc)
    assert voltages.shape == (T, B, OUT)
    assert jnp.allclose(voltages, ref, atol=1e-5, rtol=1e-5)

    print("KERNEL_OK")
</pallas_src>

<mosaic_0001>
module attributes {stable_mosaic.version = 11 : i64} {
  func.func @snn_kernel(%arg0: i32, %arg1: memref<64x64xf32, #tpu.memory_space<vmem>>, %arg2: memref<64x32xf32, #tpu.memory_space<vmem>>, %arg3: memref<32x32xf32, #tpu.memory_space<vmem>>, %arg4: memref<32x128xf32, #tpu.memory_space<vmem>>, %arg5: memref<64x128xf32, #tpu.memory_space<vmem>>, %arg6: memref<8x32xf32, #tpu.memory_space<vmem>>, %arg7: memref<8x32xf32, #tpu.memory_space<vmem>>, %arg8: memref<8x32xf32, #tpu.memory_space<vmem>>, %arg9: memref<8x128xf32, #tpu.memory_space<vmem>>, %arg10: memref<8x128xf32, #tpu.memory_space<vmem>>, %arg11: memref<64x32xf32, #tpu.memory_space<vmem>>, %arg12: memref<64x32xf32, #tpu.memory_space<vmem>>) attributes {dimension_semantics = [#tpu.dimension_semantics<arbitrary>], iteration_bounds = array<i64: 1>, scalar_prefetch = 0 : i64, scratch_operands = 7 : i64, tpu.core_type = #tpu.core_type<tc>, window_params = [{transform_indices = @transform_0, window_bounds = array<i64: 64, 64>}, {pipeline_mode = #tpu.pipeline_mode<synchronous>, transform_indices = @transform_1, window_bounds = array<i64: 64, 32>}, {pipeline_mode = #tpu.pipeline_mode<synchronous>, transform_indices = @transform_2, window_bounds = array<i64: 32, 32>}, {pipeline_mode = #tpu.pipeline_mode<synchronous>, transform_indices = @transform_3, window_bounds = array<i64: 32, 128>}, {transform_indices = @transform_4, window_bounds = array<i64: 64, 128>}]} {
    %c0_i32 = arith.constant 0 : i32
    %0 = arith.cmpi eq, %arg0, %c0_i32 : i32
    %1 = arith.extui %0 : i1 to i32
    %c0_i32_0 = arith.constant 0 : i32
    %2 = arith.cmpi ne, %1, %c0_i32_0 : i32
    scf.if %2 {
      %cst_181 = arith.constant 0.000000e+00 : f32
      %390 = vector.broadcast %cst_181 : f32 to vector<8x32xf32>
      %c0_182 = arith.constant 0 : index
      %c0_183 = arith.constant 0 : index
      %391 = vector.load %arg6[%c0_182, %c0_183] : memref<8x32xf32, #tpu.memory_space<vmem>>, vector<8x32xf32>
      tpu.vector_store %arg6[%c0_182, %c0_183], %390 {strides = array<i32>} : memref<8x32xf32, #tpu.memory_space<vmem>>, vector<8x32xf32>,
      %cst_184 = arith.constant 0.000000e+00 : f32
      %392 = vector.broadcast %cst_184 : f32 to vector<8x32xf32>
      %c0_185 = arith.constant 0 : index
      %c0_186 = arith.constant 0 : index
      %393 = vector.load %arg7[%c0_185, %c0_186] : memref<8x32xf32, #tpu.memory_space<vmem>>, vector<8x32xf32>
      tpu.vector_store %arg7[%c0_185, %c0_186], %392 {strides = array<i32>} : memref<8x32xf32, #tpu.memory_space<vmem>>, vector<8x32xf32>,
      %cst_187 = arith.constant 0.000000e+00 : f32
      %394 = vector.broadcast %cst_187 : f32 to vector<8x32xf32>
      %c0_188 = arith.constant 0 : index
      %c0_189 = arith.constant 0 : index
      %395 = vector.load %arg8[%c0_188, %c0_189] : memref<8x32xf32, #tpu.memory_space<vmem>>, vector<8x32xf32>
      tpu.vector_store %arg8[%c0_188, %c0_189], %394 {strides = array<i32>} : memref<8x32xf32, #tpu.memory_space<vmem>>, vector<8x32xf32>,
      %cst_190 = arith.constant 0.000000e+00 : f32
      %396 = vector.broadcast %cst_190 : f32 to vector<8x128xf32>
      %c0_191 = arith.constant 0 : index
      %c0_192 = arith.constant 0 : index
      %397 = vector.load %arg9[%c0_191, %c0_192] : memref<8x128xf32, #tpu.memory_space<vmem>>, vector<8x128xf32>
      tpu.vector_store %arg9[%c0_191, %c0_192], %396 {strides = array<i32>} : memref<8x128xf32, #tpu.memory_space<vmem>>, vector<8x128xf32>,
      %cst_193 = arith.constant 0.000000e+00 : f32
      %398 = vector.broadcast %cst_193 : f32 to vector<8x128xf32>
      %c0_194 = arith.constant 0 : index
      %c0_195 = arith.constant 0 : index
      %399 = vector.load %arg10[%c0_194, %c0_195] : memref<8x128xf32, #tpu.memory_space<vmem>>, vector<8x128xf32>
      tpu.vector_store %arg10[%c0_194, %c0_195], %398 {strides = array<i32>} : memref<8x128xf32, #tpu.memory_space<vmem>>, vector<8x128xf32>,
    } else {
    }
    %c0 = arith.constant 0 : index
    %c0_1 = arith.constant 0 : index
    %3 = vector.load %arg1[%c0, %c0_1] : memref<64x64xf32, #tpu.memory_space<vmem>>, vector<64x64xf32>
    %c0_2 = arith.constant 0 : index
    %c0_3 = arith.constant 0 : index
    %4 = vector.load %arg2[%c0_2, %c0_3] : memref<64x32xf32, #tpu.memory_space<vmem>>, vector<64x32xf32>
    %cst = arith.constant dense<0.000000e+00> : vector<64x32xf32>
    %5 = tpu.matmul %3, %4, %cst {dimension_numbers = #tpu.dot_dimension_numbers<[1], [0], [0], [1], [0, 0, 1, 1], [], []>} : vector<64x64xf32>, vector<64x32xf32>, vector<64x32xf32> -> vector<64x32xf32>
    %c0_4 = arith.constant 0 : index
    %c0_5 = arith.constant 0 : index
    %6 = vector.load %arg11[%c0_4, %c0_5] : memref<64x32xf32, #tpu.memory_space<vmem>>, vector<64x32xf32>
    tpu.vector_store %arg11[%c0_4, %c0_5], %5 {strides = array<i32>} : memref<64x32xf32, #tpu.memory_space<vmem>>, vector<64x32xf32>,
    %c0_6 = arith.constant 0 : index
    %c0_7 = arith.constant 0 : index
    %7 = vector.load %arg3[%c0_6, %c0_7] : memref<32x32xf32, #tpu.memory_space<vmem>>, vector<32x32xf32>
    %c0_8 = arith.constant 0 : index
    %c0_9 = arith.constant 0 : index
    %8 = vector.load %arg6[%c0_8, %c0_9] : memref<8x32xf32, #tpu.memory_space<vmem>>, vector<8x32xf32>
    %c0_10 = arith.constant 0 : index
    %c0_11 = arith.constant 0 : index
    %9 = vector.load %arg7[%c0_10, %c0_11] : memref<8x32xf32, #tpu.memory_space<vmem>>, vector<8x32xf32>
    %c0_12 = arith.constant 0 : index
    %c0_13 = arith.constant 0 : index
    %10 = vector.load %arg8[%c0_12, %c0_13] : memref<8x32xf32, #tpu.memory_space<vmem>>, vector<8x32xf32>
    %c0_i32_14 = arith.constant 0 : i32
    %c8_i32 = arith.constant 8 : i32
    %11 = arith.muli %c0_i32_14, %c8_i32 : i32
    %12 = tpu.assume_multiple %11, 8 : i32
    %cst_15 = arith.constant 0.000000e+00 : f32
    %13 = vector.broadcast %cst_15 : f32 to vector<8x32xf32>
    %14 = arith.subf %13, %9 : vector<8x32xf32>
    %15 = arith.addf %14, %10 : vector<8x32xf32>
    %cst_16 = arith.constant 1.000000e-01 : f32
    %16 = vector.broadcast %cst_16 : f32 to vector<8x32xf32>
    %17 = arith.mulf %16, %15 : vector<8x32xf32>
    %18 = arith.addf %9, %17 : vector<8x32xf32>
    %cst_17 = arith.constant 2.000000e-01 : f32
    %19 = vector.broadcast %cst_17 : f32 to vector<8x32xf32>
    %20 = arith.mulf %19, %10 : vector<8x32xf32>
    %21 = arith.subf %10, %20 : vector<8x32xf32>
    %cst_18 = arith.constant 5.000000e-01 : f32
    %22 = vector.broadcast %cst_18 : f32 to vector<8x32xf32>
    %23 = arith.subf %18, %22 : vector<8x32xf32>
    %cst_19 = arith.constant 0.000000e+00 : f32
    %24 = vector.broadcast %cst_19 : f32 to vector<8x32xf32>
    %25 = arith.cmpf ogt, %23, %24 : vector<8x32xf32>
    %26 = arith.extui %25 : vector<8x32xi1> to vector<8x32xi32>
    %27 = arith.sitofp %26 : vector<8x32xi32> to vector<8x32xf32>
    %cst_20 = arith.constant 1.000000e+00 : f32
    %28 = vector.broadcast %cst_20 : f32 to vector<8x32xf32>
    %29 = arith.subf %28, %27 : vector<8x32xf32>
    %30 = arith.mulf %29, %18 : vector<8x32xf32>
    %cst_21 = arith.constant 0.000000e+00 : f32
    %31 = vector.broadcast %cst_21 : f32 to vector<8x32xf32>
    %32 = arith.mulf %27, %31 : vector<8x32xf32>
    %33 = arith.addf %30, %32 : vector<8x32xf32>
    %34 = arith.index_cast %12 : i32 to index
    %c0_22 = arith.constant 0 : index
    %35 = vector.load %arg11[%34, %c0_22] : memref<64x32xf32, #tpu.memory_space<vmem>>, vector<8x32xf32>
    %36 = arith.addf %21, %35 : vector<8x32xf32>
    %cst_23 = arith.constant dense<0.000000e+00> : vector<8x32xf32>
    %37 = tpu.matmul %8, %7, %cst_23 {dimension_numbers = #tpu.dot_dimension_numbers<[1], [0], [0], [1], [0, 0, 1, 1], [], []>} : vector<8x32xf32>, vector<32x32xf32>, vector<8x32xf32> -> vector<8x32xf32>
    %38 = arith.addf %36, %37 : vector<8x32xf32>
    %39 = arith.index_cast %12 : i32 to index
    %c0_24 = arith.constant 0 : index
    %40 = vector.load %arg12[%39, %c0_24] : memref<64x32xf32, #tpu.memory_space<vmem>>, vector<8x32xf32>
    tpu.vector_store %arg12[%39, %c0_24], %27 {strides = array<i32>} : memref<64x32xf32, #tpu.memory_space<vmem>>, vector<8x32xf32>,
    %c1_i32 = arith.constant 1 : i32
    %c8_i32_25 = arith.constant 8 : i32
    %41 = arith.muli %c1_i32, %c8_i32_25 : i32
    %42 = tpu.assume_multiple %41, 8 : i32
    %cst_26 = arith.constant 0.000000e+00 : f32
    %43 = vector.broadcast %cst_26 : f32 to vector<8x32xf32>
    %44 = arith.subf %43, %33 : vector<8x32xf32>
    %45 = arith.addf %44, %38 : vector<8x32xf32>
    %cst_27 = arith.constant 1.000000e-01 : f32
    %46 = vector.broadcast %cst_27 : f32 to vector<8x32xf32>
    %47 = arith.mulf %46, %45 : vector<8x32xf32>
    %48 = arith.addf %33, %47 : vector<8x32xf32>
    %cst_28 = arith.constant 2.000000e-01 : f32
    %49 = vector.broadcast %cst_28 : f32 to vector<8x32xf32>
    %50 = arith.mulf %49, %38 : vector<8x32xf32>
    %51 = arith.subf %38, %50 : vector<8x32xf32>
    %cst_29 = arith.constant 5.000000e-01 : f32
    %52 = vector.broadcast %cst_29 : f32 to vector<8x32xf32>
    %53 = arith.subf %48, %52 : vector<8x32xf32>
    %cst_30 = arith.constant 0.000000e+00 : f32
    %54 = vector.broadcast %cst_30 : f32 to vector<8x32xf32>
    %55 = arith.cmpf ogt, %53, %54 : vector<8x32xf32>
    %56 = arith.extui %55 : vector<8x32xi1> to vector<8x32xi32>
    %57 = arith.sitofp %56 : vector<8x32xi32> to vector<8x32xf32>
    %cst_31 = arith.constant 1.000000e+00 : f32
    %58 = vector.broadcast %cst_31 : f32 to vector<8x32xf32>
    %59 = arith.subf %58, %57 : vector<8x32xf32>
    %60 = arith.mulf %59, %48 : vector<8x32xf32>
    %cst_32 = arith.constant 0.000000e+00 : f32
    %61 = vector.broadcast %cst_32 : f32 to vector<8x32xf32>
    %62 = arith.mulf %57, %61 : vector<8x32xf32>
    %63 = arith.addf %60, %62 : vector<8x32xf32>
    %64 = arith.index_cast %42 : i32 to index
    %c0_33 = arith.constant 0 : index
    %65 = vector.load %arg11[%64, %c0_33] : memref<64x32xf32, #tpu.memory_space<vmem>>, vector<8x32xf32>
    %66 = arith.addf %51, %65 : vector<8x32xf32>
    %cst_34 = arith.constant dense<0.000000e+00> : vector<8x32xf32>
    %67 = tpu.matmul %27, %7, %cst_34 {dimension_numbers = #tpu.dot_dimension_numbers<[1], [0], [0], [1], [0, 0, 1, 1], [], []>} : vector<8x32xf32>, vector<32x32xf32>, vector<8x32xf32> -> vector<8x32xf32>
    %68 = arith.addf %66, %67 : vector<8x32xf32>
    %69 = arith.index_cast %42 : i32 to index
    %c0_35 = arith.constant 0 : index
    %70 = vector.load %arg12[%69, %c0_35] : memref<64x32xf32, #tpu.memory_space<vmem>>, vector<8x32xf32>
    tpu.vector_store %arg12[%69, %c0_35], %57 {strides = array<i32>} : memref<64x32xf32, #tpu.memory_space<vmem>>, vector<8x32xf32>,
    %c2_i32 = arith.constant 2 : i32
    %c8_i32_36 = arith.constant 8 : i32
    %71 = arith.muli %c2_i32, %c8_i32_36 : i32
    %72 = tpu.assume_multiple %71, 8 : i32
    %cst_37 = arith.constant 0.000000e+00 : f32
    %73 = vector.broadcast %cst_37 : f32 to vector<8x32xf32>
    %74 = arith.subf %73, %63 : vector<8x32xf32>
    %75 = arith.addf %74, %68 : vector<8x32xf32>
    %cst_38 = arith.constant 1.000000e-01 : f32
    %76 = vector.broadcast %cst_38 : f32 to vector<8x32xf32>
    %77 = arith.mulf %76, %75 : vector<8x32xf32>
    %78 = arith.addf %63, %77 : vector<8x32xf32>
    %cst_39 = arith.constant 2.000000e-01 : f32
    %79 = vector.broadcast %cst_39 : f32 to vector<8x32xf32>
    %80 = arith.mulf %79, %68 : vector<8x32xf32>
    %81 = arith.subf %68, %80 : vector<8x32xf32>
    %cst_40 = arith.constant 5.000000e-01 : f32
    %82 = vector.broadcast %cst_40 : f32 to vector<8x32xf32>
    %83 = arith.subf %78, %82 : vector<8x32xf32>
    %cst_41 = arith.constant 0.000000e+00 : f32
    %84 = vector.broadcast %cst_41 : f32 to vector<8x32xf32>
    %85 = arith.cmpf ogt, %83, %84 : vector<8x32xf32>
    %86 = arith.extui %85 : vector<8x32xi1> to vector<8x32xi32>
    %87 = arith.sitofp %86 : vector<8x32xi32> to vector<8x32xf32>
    %cst_42 = arith.constant 1.000000e+00 : f32
    %88 = vector.broadcast %cst_42 : f32 to vector<8x32xf32>
    %89 = arith.subf %88, %87 : vector<8x32xf32>
    %90 = arith.mulf %89, %78 : vector<8x32xf32>
    %cst_43 = arith.constant 0.000000e+00 : f32
    %91 = vector.broadcast %cst_43 : f32 to vector<8x32xf32>
    %92 = arith.mulf %87, %91 : vector<8x32xf32>
    %93 = arith.addf %90, %92 : vector<8x32xf32>
    %94 = arith.index_cast %72 : i32 to index
    %c0_44 = arith.constant 0 : index
    %95 = vector.load %arg11[%94, %c0_44] : memref<64x32xf32, #tpu.memory_space<vmem>>, vector<8x32xf32>
    %96 = arith.addf %81, %95 : vector<8x32xf32>
    %cst_45 = arith.constant dense<0.000000e+00> : vector<8x32xf32>
    %97 = tpu.matmul %57, %7, %cst_45 {dimension_numbers = #tpu.dot_dimension_numbers<[1], [0], [0], [1], [0, 0, 1, 1], [], []>} : vector<8x32xf32>, vector<32x32xf32>, vector<8x32xf32> -> vector<8x32xf32>
    %98 = arith.addf %96, %97 : vector<8x32xf32>
    %99 = arith.index_cast %72 : i32 to index
    %c0_46 = arith.constant 0 : index
    %100 = vector.load %arg12[%99, %c0_46] : memref<64x32xf32, #tpu.memory_space<vmem>>, vector<8x32xf32>
    tpu.vector_store %arg12[%99, %c0_46], %87 {strides = array<i32>} : memref<64x32xf32, #tpu.memory_space<vmem>>, vector<8x32xf32>,
    %c3_i32 = arith.constant 3 : i32
    %c8_i32_47 = arith.constant 8 : i32
    %101 = arith.muli %c3_i32, %c8_i32_47 : i32
    %102 = tpu.assume_multiple %101, 8 : i32
    %cst_48 = arith.constant 0.000000e+00 : f32
    %103 = vector.broadcast %cst_48 : f32 to vector<8x32xf32>
    %104 = arith.subf %103, %93 : vector<8x32xf32>
    %105 = arith.addf %104, %98 : vector<8x32xf32>
    %cst_49 = arith.constant 1.000000e-01 : f32
    %106 = vector.broadcast %cst_49 : f32 to vector<8x32xf32>
    %107 = arith.mulf %106, %105 : vector<8x32xf32>
    %108 = arith.addf %93, %107 : vector<8x32xf32>
    %cst_50 = arith.constant 2.000000e-01 : f32
    %109 = vector.broadcast %cst_50 : f32 to vector<8x32xf32>
    %110 = arith.mulf %109, %98 : vector<8x32xf32>
    %111 = arith.subf %98, %110 : vector<8x32xf32>
    %cst_51 = arith.constant 5.000000e-01 : f32
    %112 = vector.broadcast %cst_51 : f32 to vector<8x32xf32>
    %113 = arith.subf %108, %112 : vector<8x32xf32>
    %cst_52 = arith.constant 0.000000e+00 : f32
    %114 = vector.broadcast %cst_52 : f32 to vector<8x32xf32>
    %115 = arith.cmpf ogt, %113, %114 : vector<8x32xf32>
    %116 = arith.extui %115 : vector<8x32xi1> to vector<8x32xi32>
    %117 = arith.sitofp %116 : vector<8x32xi32> to vector<8x32xf32>
    %cst_53 = arith.constant 1.000000e+00 : f32
    %118 = vector.broadcast %cst_53 : f32 to vector<8x32xf32>
    %119 = arith.subf %118, %117 : vector<8x32xf32>
    %120 = arith.mulf %119, %108 : vector<8x32xf32>
    %cst_54 = arith.constant 0.000000e+00 : f32
    %121 = vector.broadcast %cst_54 : f32 to vector<8x32xf32>
    %122 = arith.mulf %117, %121 : vector<8x32xf32>
    %123 = arith.addf %120, %122 : vector<8x32xf32>
    %124 = arith.index_cast %102 : i32 to index
    %c0_55 = arith.constant 0 : index
    %125 = vector.load %arg11[%124, %c0_55] : memref<64x32xf32, #tpu.memory_space<vmem>>, vector<8x32xf32>
    %126 = arith.addf %111, %125 : vector<8x32xf32>
    %cst_56 = arith.constant dense<0.000000e+00> : vector<8x32xf32>
    %127 = tpu.matmul %87, %7, %cst_56 {dimension_numbers = #tpu.dot_dimension_numbers<[1], [0], [0], [1], [0, 0, 1, 1], [], []>} : vector<8x32xf32>, vector<32x32xf32>, vector<8x32xf32> -> vector<8x32xf32>
    %128 = arith.addf %126, %127 : vector<8x32xf32>
    %129 = arith.index_cast %102 : i32 to index
    %c0_57 = arith.constant 0 : index
    %130 = vector.load %arg12[%129, %c0_57] : memref<64x32xf32, #tpu.memory_space<vmem>>, vector<8x32xf32>
    tpu.vector_store %arg12[%129, %c0_57], %117 {strides = array<i32>} : memref<64x32xf32, #tpu.memory_space<vmem>>, vector<8x32xf32>,
    %c4_i32 = arith.constant 4 : i32
    %c8_i32_58 = arith.constant 8 : i32
    %131 = arith.muli %c4_i32, %c8_i32_58 : i32
    %132 = tpu.assume_multiple %131, 8 : i32
    %cst_59 = arith.constant 0.000000e+00 : f32
    %133 = vector.broadcast %cst_59 : f32 to vector<8x32xf32>
    %134 = arith.subf %133, %123 : vector<8x32xf32>
    %135 = arith.addf %134, %128 : vector<8x32xf32>
    %cst_60 = arith.constant 1.000000e-01 : f32
    %136 = vector.broadcast %cst_60 : f32 to vector<8x32xf32>
    %137 = arith.mulf %136, %135 : vector<8x32xf32>
    %138 = arith.addf %123, %137 : vector<8x32xf32>
    %cst_61 = arith.constant 2.000000e-01 : f32
    %139 = vector.broadcast %cst_61 : f32 to vector<8x32xf32>
    %140 = arith.mulf %139, %128 : vector<8x32xf32>
    %141 = arith.subf %128, %140 : vector<8x32xf32>
    %cst_62 = arith.constant 5.000000e-01 : f32
    %142 = vector.broadcast %cst_62 : f32 to vector<8x32xf32>
    %143 = arith.subf %138, %142 : vector<8x32xf32>
    %cst_63 = arith.constant 0.000000e+00 : f32
    %144 = vector.broadcast %cst_63 : f32 to vector<8x32xf32>
    %145 = arith.cmpf ogt, %143, %144 : vector<8x32xf32>
    %146 = arith.extui %145 : vector<8x32xi1> to vector<8x32xi32>
    %147 = arith.sitofp %146 : vector<8x32xi32> to vector<8x32xf32>
    %cst_64 = arith.constant 1.000000e+00 : f32
    %148 = vector.broadcast %cst_64 : f32 to vector<8x32xf32>
    %149 = arith.subf %148, %147 : vector<8x32xf32>
    %150 = arith.mulf %149, %138 : vector<8x32xf32>
    %cst_65 = arith.constant 0.000000e+00 : f32
    %151 = vector.broadcast %cst_65 : f32 to vector<8x32xf32>
    %152 = arith.mulf %147, %151 : vector<8x32xf32>
    %153 = arith.addf %150, %152 : vector<8x32xf32>
    %154 = arith.index_cast %132 : i32 to index
    %c0_66 = arith.constant 0 : index
    %155 = vector.load %arg11[%154, %c0_66] : memref<64x32xf32, #tpu.memory_space<vmem>>, vector<8x32xf32>
    %156 = arith.addf %141, %155 : vector<8x32xf32>
    %cst_67 = arith.constant dense<0.000000e+00> : vector<8x32xf32>
    %157 = tpu.matmul %117, %7, %cst_67 {dimension_numbers = #tpu.dot_dimension_numbers<[1], [0], [0], [1], [0, 0, 1, 1], [], []>} : vector<8x32xf32>, vector<32x32xf32>, vector<8x32xf32> -> vector<8x32xf32>
    %158 = arith.addf %156, %157 : vector<8x32xf32>
    %159 = arith.index_cast %132 : i32 to index
    %c0_68 = arith.constant 0 : index
    %160 = vector.load %arg12[%159, %c0_68] : memref<64x32xf32, #tpu.memory_space<vmem>>, vector<8x32xf32>
    tpu.vector_store %arg12[%159, %c0_68], %147 {strides = array<i32>} : memref<64x32xf32, #tpu.memory_space<vmem>>, vector<8x32xf32>,
    %c5_i32 = arith.constant 5 : i32
    %c8_i32_69 = arith.constant 8 : i32
    %161 = arith.muli %c5_i32, %c8_i32_69 : i32
    %162 = tpu.assume_multiple %161, 8 : i32
    %cst_70 = arith.constant 0.000000e+00 : f32
    %163 = vector.broadcast %cst_70 : f32 to vector<8x32xf32>
    %164 = arith.subf %163, %153 : vector<8x32xf32>
    %165 = arith.addf %164, %158 : vector<8x32xf32>
    %cst_71 = arith.constant 1.000000e-01 : f32
    %166 = vector.broadcast %cst_71 : f32 to vector<8x32xf32>
    %167 = arith.mulf %166, %165 : vector<8x32xf32>
    %168 = arith.addf %153, %167 : vector<8x32xf32>
    %cst_72 = arith.constant 2.000000e-01 : f32
    %169 = vector.broadcast %cst_72 : f32 to vector<8x32xf32>
    %170 = arith.mulf %169, %158 : vector<8x32xf32>
    %171 = arith.subf %158, %170 : vector<8x32xf32>
    %cst_73 = arith.constant 5.000000e-01 : f32
    %172 = vector.broadcast %cst_73 : f32 to vector<8x32xf32>
    %173 = arith.subf %168, %172 : vector<8x32xf32>
    %cst_74 = arith.constant 0.000000e+00 : f32
    %174 = vector.broadcast %cst_74 : f32 to vector<8x32xf32>
    %175 = arith.cmpf ogt, %173, %174 : vector<8x32xf32>
    %176 = arith.extui %175 : vector<8x32xi1> to vector<8x32xi32>
    %177 = arith.sitofp %176 : vector<8x32xi32> to vector<8x32xf32>
    %cst_75 = arith.constant 1.000000e+00 : f32
    %178 = vector.broadcast %cst_75 : f32 to vector<8x32xf32>
    %179 = arith.subf %178, %177 : vector<8x32xf32>
    %180 = arith.mulf %179, %168 : vector<8x32xf32>
    %cst_76 = arith.constant 0.000000e+00 : f32
    %181 = vector.broadcast %cst_76 : f32 to vector<8x32xf32>
    %182 = arith.mulf %177, %181 : vector<8x32xf32>
    %183 = arith.addf %180, %182 : vector<8x32xf32>
    %184 = arith.index_cast %162 : i32 to index
    %c0_77 = arith.constant 0 : index
    %185 = vector.load %arg11[%184, %c0_77] : memref<64x32xf32, #tpu.memory_space<vmem>>, vector<8x32xf32>
    %186 = arith.addf %171, %185 : vector<8x32xf32>
    %cst_78 = arith.constant dense<0.000000e+00> : vector<8x32xf32>
    %187 = tpu.matmul %147, %7, %cst_78 {dimension_numbers = #tpu.dot_dimension_numbers<[1], [0], [0], [1], [0, 0, 1, 1], [], []>} : vector<8x32xf32>, vector<32x32xf32>, vector<8x32xf32> -> vector<8x32xf32>
    %188 = arith.addf %186, %187 : vector<8x32xf32>
    %189 = arith.index_cast %162 : i32 to index
    %c0_79 = arith.constant 0 : index
    %190 = vector.load %arg12[%189, %c0_79] : memref<64x32xf32, #tpu.memory_space<vmem>>, vector<8x32xf32>
    tpu.vector_store %arg12[%189, %c0_79], %177 {strides = array<i32>} : memref<64x32xf32, #tpu.memory_space<vmem>>, vector<8x32xf32>,
    %c6_i32 = arith.constant 6 : i32
    %c8_i32_80 = arith.constant 8 : i32
    %191 = arith.muli %c6_i32, %c8_i32_80 : i32
    %192 = tpu.assume_multiple %191, 8 : i32
    %cst_81 = arith.constant 0.000000e+00 : f32
    %193 = vector.broadcast %cst_81 : f32 to vector<8x32xf32>
    %194 = arith.subf %193, %183 : vector<8x32xf32>
    %195 = arith.addf %194, %188 : vector<8x32xf32>
    %cst_82 = arith.constant 1.000000e-01 : f32
    %196 = vector.broadcast %cst_82 : f32 to vector<8x32xf32>
    %197 = arith.mulf %196, %195 : vector<8x32xf32>
    %198 = arith.addf %183, %197 : vector<8x32xf32>
    %cst_83 = arith.constant 2.000000e-01 : f32
    %199 = vector.broadcast %cst_83 : f32 to vector<8x32xf32>
    %200 = arith.mulf %199, %188 : vector<8x32xf32>
    %201 = arith.subf %188, %200 : vector<8x32xf32>
    %cst_84 = arith.constant 5.000000e-01 : f32
    %202 = vector.broadcast %cst_84 : f32 to vector<8x32xf32>
    %203 = arith.subf %198, %202 : vector<8x32xf32>
    %cst_85 = arith.constant 0.000000e+00 : f32
    %204 = vector.broadcast %cst_85 : f32 to vector<8x32xf32>
    %205 = arith.cmpf ogt, %203, %204 : vector<8x32xf32>
    %206 = arith.extui %205 : vector<8x32xi1> to vector<8x32xi32>
    %207 = arith.sitofp %206 : vector<8x32xi32> to vector<8x32xf32>
    %cst_86 = arith.constant 1.000000e+00 : f32
    %208 = vector.broadcast %cst_86 : f32 to vector<8x32xf32>
    %209 = arith.subf %208, %207 : vector<8x32xf32>
    %210 = arith.mulf %209, %198 : vector<8x32xf32>
    %cst_87 = arith.constant 0.000000e+00 : f32
    %211 = vector.broadcast %cst_87 : f32 to vector<8x32xf32>
    %212 = arith.mulf %207, %211 : vector<8x32xf32>
    %213 = arith.addf %210, %212 : vector<8x32xf32>
    %214 = arith.index_cast %192 : i32 to index
    %c0_88 = arith.constant 0 : index
    %215 = vector.load %arg11[%214, %c0_88] : memref<64x32xf32, #tpu.memory_space<vmem>>, vector<8x32xf32>
    %216 = arith.addf %201, %215 : vector<8x32xf32>
    %cst_89 = arith.constant dense<0.000000e+00> : vector<8x32xf32>
    %217 = tpu.matmul %177, %7, %cst_89 {dimension_numbers = #tpu.dot_dimension_numbers<[1], [0], [0], [1], [0, 0, 1, 1], [], []>} : vector<8x32xf32>, vector<32x32xf32>, vector<8x32xf32> -> vector<8x32xf32>
    %218 = arith.addf %216, %217 : vector<8x32xf32>
    %219 = arith.index_cast %192 : i32 to index
    %c0_90 = arith.constant 0 : index
    %220 = vector.load %arg12[%219, %c0_90] : memref<64x32xf32, #tpu.memory_space<vmem>>, vector<8x32xf32>
    tpu.vector_store %arg12[%219, %c0_90], %207 {strides = array<i32>} : memref<64x32xf32, #tpu.memory_space<vmem>>, vector<8x32xf32>,
    %c7_i32 = arith.constant 7 : i32
    %c8_i32_91 = arith.constant 8 : i32
    %221 = arith.muli %c7_i32, %c8_i32_91 : i32
    %222 = tpu.assume_multiple %221, 8 : i32
    %cst_92 = arith.constant 0.000000e+00 : f32
    %223 = vector.broadcast %cst_92 : f32 to vector<8x32xf32>
    %224 = arith.subf %223, %213 : vector<8x32xf32>
    %225 = arith.addf %224, %218 : vector<8x32xf32>
    %cst_93 = arith.constant 1.000000e-01 : f32
    %226 = vector.broadcast %cst_93 : f32 to vector<8x32xf32>
    %227 = arith.mulf %226, %225 : vector<8x32xf32>
    %228 = arith.addf %213, %227 : vector<8x32xf32>
    %cst_94 = arith.constant 2.000000e-01 : f32
    %229 = vector.broadcast %cst_94 : f32 to vector<8x32xf32>
    %230 = arith.mulf %229, %218 : vector<8x32xf32>
    %231 = arith.subf %218, %230 : vector<8x32xf32>
    %cst_95 = arith.constant 5.000000e-01 : f32
    %232 = vector.broadcast %cst_95 : f32 to vector<8x32xf32>
    %233 = arith.subf %228, %232 : vector<8x32xf32>
    %cst_96 = arith.constant 0.000000e+00 : f32
    %234 = vector.broadcast %cst_96 : f32 to vector<8x32xf32>
    %235 = arith.cmpf ogt, %233, %234 : vector<8x32xf32>
    %236 = arith.extui %235 : vector<8x32xi1> to vector<8x32xi32>
    %237 = arith.sitofp %236 : vector<8x32xi32> to vector<8x32xf32>
    %cst_97 = arith.constant 1.000000e+00 : f32
    %238 = vector.broadcast %cst_97 : f32 to vector<8x32xf32>
    %239 = arith.subf %238, %237 : vector<8x32xf32>
    %240 = arith.mulf %239, %228 : vector<8x32xf32>
    %cst_98 = arith.constant 0.000000e+00 : f32
    %241 = vector.broadcast %cst_98 : f32 to vector<8x32xf32>
    %242 = arith.mulf %237, %241 : vector<8x32xf32>
    %243 = arith.addf %240, %242 : vector<8x32xf32>
    %244 = arith.index_cast %222 : i32 to index
    %c0_99 = arith.constant 0 : index
    %245 = vector.load %arg11[%244, %c0_99] : memref<64x32xf32, #tpu.memory_space<vmem>>, vector<8x32xf32>
    %246 = arith.addf %231, %245 : vector<8x32xf32>
    %cst_100 = arith.constant dense<0.000000e+00> : vector<8x32xf32>
    %247 = tpu.matmul %207, %7, %cst_100 {dimension_numbers = #tpu.dot_dimension_numbers<[1], [0], [0], [1], [0, 0, 1, 1], [], []>} : vector<8x32xf32>, vector<32x32xf32>, vector<8x32xf32> -> vector<8x32xf32>
    %248 = arith.addf %246, %247 : vector<8x32xf32>
    %249 = arith.index_cast %222 : i32 to index
    %c0_101 = arith.constant 0 : index
    %250 = vector.load %arg12[%249, %c0_101] : memref<64x32xf32, #tpu.memory_space<vmem>>, vector<8x32xf32>
    tpu.vector_store %arg12[%249, %c0_101], %237 {strides = array<i32>} : memref<64x32xf32, #tpu.memory_space<vmem>>, vector<8x32xf32>,
    %c8_i32_102 = arith.constant 8 : i32
    %c0_103 = arith.constant 0 : index
    %c0_104 = arith.constant 0 : index
    %251 = vector.load %arg6[%c0_103, %c0_104] : memref<8x32xf32, #tpu.memory_space<vmem>>, vector<8x32xf32>
    tpu.vector_store %arg6[%c0_103, %c0_104], %237 {strides = array<i32>} : memref<8x32xf32, #tpu.memory_space<vmem>>, vector<8x32xf32>,
    %c0_105 = arith.constant 0 : index
    %c0_106 = arith.constant 0 : index
    %252 = vector.load %arg7[%c0_105, %c0_106] : memref<8x32xf32, #tpu.memory_space<vmem>>, vector<8x32xf32>
    tpu.vector_store %arg7[%c0_105, %c0_106], %243 {strides = array<i32>} : memref<8x32xf32, #tpu.memory_space<vmem>>, vector<8x32xf32>,
    %c0_107 = arith.constant 0 : index
    %c0_108 = arith.constant 0 : index
    %253 = vector.load %arg8[%c0_107, %c0_108] : memref<8x32xf32, #tpu.memory_space<vmem>>, vector<8x32xf32>
    tpu.vector_store %arg8[%c0_107, %c0_108], %248 {strides = array<i32>} : memref<8x32xf32, #tpu.memory_space<vmem>>, vector<8x32xf32>,
    %c0_109 = arith.constant 0 : index
    %c0_110 = arith.constant 0 : index
    %254 = vector.load %arg12[%c0_109, %c0_110] : memref<64x32xf32, #tpu.memory_space<vmem>>, vector<64x32xf32>
    %c0_111 = arith.constant 0 : index
    %c0_112 = arith.constant 0 : index
    %255 = vector.load %arg4[%c0_111, %c0_112] : memref<32x128xf32, #tpu.memory_space<vmem>>, vector<32x128xf32>
    %cst_113 = arith.constant dense<0.000000e+00> : vector<64x128xf32>
    %256 = tpu.matmul %254, %255, %cst_113 {dimension_numbers = #tpu.dot_dimension_numbers<[1], [0], [0], [1], [0, 0, 1, 1], [], []>} : vector<64x32xf32>, vector<32x128xf32>, vector<64x128xf32> -> vector<64x128xf32>
    %c0_114 = arith.constant 0 : index
    %c0_115 = arith.constant 0 : index
    %257 = vector.load %arg5[%c0_114, %c0_115] : memref<64x128xf32, #tpu.memory_space<vmem>>, vector<64x128xf32>
    tpu.vector_store %arg5[%c0_114, %c0_115], %256 {strides = array<i32>} : memref<64x128xf32, #tpu.memory_space<vmem>>, vector<64x128xf32>,
    %c0_116 = arith.constant 0 : index
    %c0_117 = arith.constant 0 : index
    %258 = vector.load %arg9[%c0_116, %c0_117] : memref<8x128xf32, #tpu.memory_space<vmem>>, vector<8x128xf32>
    %c0_118 = arith.constant 0 : index
    %c0_119 = arith.constant 0 : index
    %259 = vector.load %arg10[%c0_118, %c0_119] : memref<8x128xf32, #tpu.memory_space<vmem>>, vector<8x128xf32>
    %c0_i32_120 = arith.constant 0 : i32
    %c8_i32_121 = arith.constant 8 : i32
    %260 = arith.muli %c0_i32_120, %c8_i32_121 : i32
    %261 = tpu.assume_multiple %260, 8 : i32
    %262 = arith.index_cast %261 : i32 to index
    %c0_122 = arith.constant 0 : index
    %263 = vector.load %arg5[%262, %c0_122] : memref<64x128xf32, #tpu.memory_space<vmem>>, vector<8x128xf32>
    %cst_123 = arith.constant 0.000000e+00 : f32
    %264 = vector.broadcast %cst_123 : f32 to vector<8x128xf32>
    %265 = arith.subf %264, %258 : vector<8x128xf32>
    %266 = arith.addf %265, %259 : vector<8x128xf32>
    %cst_124 = arith.constant 1.000000e-01 : f32
    %267 = vector.broadcast %cst_124 : f32 to vector<8x128xf32>
    %268 = arith.mulf %267, %266 : vector<8x128xf32>
    %269 = arith.addf %258, %268 : vector<8x128xf32>
    %cst_125 = arith.constant 2.000000e-01 : f32
    %270 = vector.broadcast %cst_125 : f32 to vector<8x128xf32>
    %271 = arith.mulf %270, %259 : vector<8x128xf32>
    %272 = arith.subf %259, %271 : vector<8x128xf32>
    %273 = arith.addf %272, %263 : vector<8x128xf32>
    %274 = arith.index_cast %261 : i32 to index
    %c0_126 = arith.constant 0 : index
    %275 = vector.load %arg5[%274, %c0_126] : memref<64x128xf32, #tpu.memory_space<vmem>>, vector<8x128xf32>
    tpu.vector_store %arg5[%274, %c0_126], %269 {strides = array<i32>} : memref<64x128xf32, #tpu.memory_space<vmem>>, vector<8x128xf32>,
    %c1_i32_127 = arith.constant 1 : i32
    %c8_i32_128 = arith.constant 8 : i32
    %276 = arith.muli %c1_i32_127, %c8_i32_128 : i32
    %277 = tpu.assume_multiple %276, 8 : i32
    %278 = arith.index_cast %277 : i32 to index
    %c0_129 = arith.constant 0 : index
    %279 = vector.load %arg5[%278, %c0_129] : memref<64x128xf32, #tpu.memory_space<vmem>>, vector<8x128xf32>
    %cst_130 = arith.constant 0.000000e+00 : f32
    %280 = vector.broadcast %cst_130 : f32 to vector<8x128xf32>
    %281 = arith.subf %280, %269 : vector<8x128xf32>
    %282 = arith.addf %281, %273 : vector<8x128xf32>
    %cst_131 = arith.constant 1.000000e-01 : f32
    %283 = vector.broadcast %cst_131 : f32 to vector<8x128xf32>
    %284 = arith.mulf %283, %282 : vector<8x128xf32>
    %285 = arith.addf %269, %284 : vector<8x128xf32>
    %cst_132 = arith.constant 2.000000e-01 : f32
    %286 = vector.broadcast %cst_132 : f32 to vector<8x128xf32>
    %287 = arith.mulf %286, %273 : vector<8x128xf32>
    %288 = arith.subf %273, %287 : vector<8x128xf32>
    %289 = arith.addf %288, %279 : vector<8x128xf32>
    %290 = arith.index_cast %277 : i32 to index
    %c0_133 = arith.constant 0 : index
    %291 = vector.load %arg5[%290, %c0_133] : memref<64x128xf32, #tpu.memory_space<vmem>>, vector<8x128xf32>
    tpu.vector_store %arg5[%290, %c0_133], %285 {strides = array<i32>} : memref<64x128xf32, #tpu.memory_space<vmem>>, vector<8x128xf32>,
    %c2_i32_134 = arith.constant 2 : i32
    %c8_i32_135 = arith.constant 8 : i32
    %292 = arith.muli %c2_i32_134, %c8_i32_135 : i32
    %293 = tpu.assume_multiple %292, 8 : i32
    %294 = arith.index_cast %293 : i32 to index
    %c0_136 = arith.constant 0 : index
    %295 = vector.load %arg5[%294, %c0_136] : memref<64x128xf32, #tpu.memory_space<vmem>>, vector<8x128xf32>
    %cst_137 = arith.constant 0.000000e+00 : f32
    %296 = vector.broadcast %cst_137 : f32 to vector<8x128xf32>
    %297 = arith.subf %296, %285 : vector<8x128xf32>
    %298 = arith.addf %297, %289 : vector<8x128xf32>
    %cst_138 = arith.constant 1.000000e-01 : f32
    %299 = vector.broadcast %cst_138 : f32 to vector<8x128xf32>
    %300 = arith.mulf %299, %298 : vector<8x128xf32>
    %301 = arith.addf %285, %300 : vector<8x128xf32>
    %cst_139 = arith.constant 2.000000e-01 : f32
    %302 = vector.broadcast %cst_139 : f32 to vector<8x128xf32>
    %303 = arith.mulf %302, %289 : vector<8x128xf32>
    %304 = arith.subf %289, %303 : vector<8x128xf32>
    %305 = arith.addf %304, %295 : vector<8x128xf32>
    %306 = arith.index_cast %293 : i32 to index
    %c0_140 = arith.constant 0 : index
    %307 = vector.load %arg5[%306, %c0_140] : memref<64x128xf32, #tpu.memory_space<vmem>>, vector<8x128xf32>
    tpu.vector_store %arg5[%306, %c0_140], %301 {strides = array<i32>} : memref<64x128xf32, #tpu.memory_space<vmem>>, vector<8x128xf32>,
    %c3_i32_141 = arith.constant 3 : i32
    %c8_i32_142 = arith.constant 8 : i32
    %308 = arith.muli %c3_i32_141, %c8_i32_142 : i32
    %309 = tpu.assume_multiple %308, 8 : i32
    %310 = arith.index_cast %309 : i32 to index
    %c0_143 = arith.constant 0 : index
    %311 = vector.load %arg5[%310, %c0_143] : memref<64x128xf32, #tpu.memory_space<vmem>>, vector<8x128xf32>
    %cst_144 = arith.constant 0.000000e+00 : f32
    %312 = vector.broadcast %cst_144 : f32 to vector<8x128xf32>
    %313 = arith.subf %312, %301 : vector<8x128xf32>
    %314 = arith.addf %313, %305 : vector<8x128xf32>
    %cst_145 = arith.constant 1.000000e-01 : f32
    %315 = vector.broadcast %cst_145 : f32 to vector<8x128xf32>
    %316 = arith.mulf %315, %314 : vector<8x128xf32>
    %317 = arith.addf %301, %316 : vector<8x128xf32>
    %cst_146 = arith.constant 2.000000e-01 : f32
    %318 = vector.broadcast %cst_146 : f32 to vector<8x128xf32>
    %319 = arith.mulf %318, %305 : vector<8x128xf32>
    %320 = arith.subf %305, %319 : vector<8x128xf32>
    %321 = arith.addf %320, %311 : vector<8x128xf32>
    %322 = arith.index_cast %309 : i32 to index
    %c0_147 = arith.constant 0 : index
    %323 = vector.load %arg5[%322, %c0_147] : memref<64x128xf32, #tpu.memory_space<vmem>>, vector<8x128xf32>
    tpu.vector_store %arg5[%322, %c0_147], %317 {strides = array<i32>} : memref<64x128xf32, #tpu.memory_space<vmem>>, vector<8x128xf32>,
    %c4_i32_148 = arith.constant 4 : i32
    %c8_i32_149 = arith.constant 8 : i32
    %324 = arith.muli %c4_i32_148, %c8_i32_149 : i32
    %325 = tpu.assume_multiple %324, 8 : i32
    %326 = arith.index_cast %325 : i32 to index
    %c0_150 = arith.constant 0 : index
    %327 = vector.load %arg5[%326, %c0_150] : memref<64x128xf32, #tpu.memory_space<vmem>>, vector<8x128xf32>
    %cst_151 = arith.constant 0.000000e+00 : f32
    %328 = vector.broadcast %cst_151 : f32 to vector<8x128xf32>
    %329 = arith.subf %328, %317 : vector<8x128xf32>
    %330 = arith.addf %329, %321 : vector<8x128xf32>
    %cst_152 = arith.constant 1.000000e-01 : f32
    %331 = vector.broadcast %cst_152 : f32 to vector<8x128xf32>
    %332 = arith.mulf %331, %330 : vector<8x128xf32>
    %333 = arith.addf %317, %332 : vector<8x128xf32>
    %cst_153 = arith.constant 2.000000e-01 : f32
    %334 = vector.broadcast %cst_153 : f32 to vector<8x128xf32>
    %335 = arith.mulf %334, %321 : vector<8x128xf32>
    %336 = arith.subf %321, %335 : vector<8x128xf32>
    %337 = arith.addf %336, %327 : vector<8x128xf32>
    %338 = arith.index_cast %325 : i32 to index
    %c0_154 = arith.constant 0 : index
    %339 = vector.load %arg5[%338, %c0_154] : memref<64x128xf32, #tpu.memory_space<vmem>>, vector<8x128xf32>
    tpu.vector_store %arg5[%338, %c0_154], %333 {strides = array<i32>} : memref<64x128xf32, #tpu.memory_space<vmem>>, vector<8x128xf32>,
    %c5_i32_155 = arith.constant 5 : i32
    %c8_i32_156 = arith.constant 8 : i32
    %340 = arith.muli %c5_i32_155, %c8_i32_156 : i32
    %341 = tpu.assume_multiple %340, 8 : i32
    %342 = arith.index_cast %341 : i32 to index
    %c0_157 = arith.constant 0 : index
    %343 = vector.load %arg5[%342, %c0_157] : memref<64x128xf32, #tpu.memory_space<vmem>>, vector<8x128xf32>
    %cst_158 = arith.constant 0.000000e+00 : f32
    %344 = vector.broadcast %cst_158 : f32 to vector<8x128xf32>
    %345 = arith.subf %344, %333 : vector<8x128xf32>
    %346 = arith.addf %345, %337 : vector<8x128xf32>
    %cst_159 = arith.constant 1.000000e-01 : f32
    %347 = vector.broadcast %cst_159 : f32 to vector<8x128xf32>
    %348 = arith.mulf %347, %346 : vector<8x128xf32>
    %349 = arith.addf %333, %348 : vector<8x128xf32>
    %cst_160 = arith.constant 2.000000e-01 : f32
    %350 = vector.broadcast %cst_160 : f32 to vector<8x128xf32>
    %351 = arith.mulf %350, %337 : vector<8x128xf32>
    %352 = arith.subf %337, %351 : vector<8x128xf32>
    %353 = arith.addf %352, %343 : vector<8x128xf32>
    %354 = arith.index_cast %341 : i32 to index
    %c0_161 = arith.constant 0 : index
    %355 = vector.load %arg5[%354, %c0_161] : memref<64x128xf32, #tpu.memory_space<vmem>>, vector<8x128xf32>
    tpu.vector_store %arg5[%354, %c0_161], %349 {strides = array<i32>} : memref<64x128xf32, #tpu.memory_space<vmem>>, vector<8x128xf32>,
    %c6_i32_162 = arith.constant 6 : i32
    %c8_i32_163 = arith.constant 8 : i32
    %356 = arith.muli %c6_i32_162, %c8_i32_163 : i32
    %357 = tpu.assume_multiple %356, 8 : i32
    %358 = arith.index_cast %357 : i32 to index
    %c0_164 = arith.constant 0 : index
    %359 = vector.load %arg5[%358, %c0_164] : memref<64x128xf32, #tpu.memory_space<vmem>>, vector<8x128xf32>
    %cst_165 = arith.constant 0.000000e+00 : f32
    %360 = vector.broadcast %cst_165 : f32 to vector<8x128xf32>
    %361 = arith.subf %360, %349 : vector<8x128xf32>
    %362 = arith.addf %361, %353 : vector<8x128xf32>
    %cst_166 = arith.constant 1.000000e-01 : f32
    %363 = vector.broadcast %cst_166 : f32 to vector<8x128xf32>
    %364 = arith.mulf %363, %362 : vector<8x128xf32>
    %365 = arith.addf %349, %364 : vector<8x128xf32>
    %cst_167 = arith.constant 2.000000e-01 : f32
    %366 = vector.broadcast %cst_167 : f32 to vector<8x128xf32>
    %367 = arith.mulf %366, %353 : vector<8x128xf32>
    %368 = arith.subf %353, %367 : vector<8x128xf32>
    %369 = arith.addf %368, %359 : vector<8x128xf32>
    %370 = arith.index_cast %357 : i32 to index
    %c0_168 = arith.constant 0 : index
    %371 = vector.load %arg5[%370, %c0_168] : memref<64x128xf32, #tpu.memory_space<vmem>>, vector<8x128xf32>
    tpu.vector_store %arg5[%370, %c0_168], %365 {strides = array<i32>} : memref<64x128xf32, #tpu.memory_space<vmem>>, vector<8x128xf32>,
    %c7_i32_169 = arith.constant 7 : i32
    %c8_i32_170 = arith.constant 8 : i32
    %372 = arith.muli %c7_i32_169, %c8_i32_170 : i32
    %373 = tpu.assume_multiple %372, 8 : i32
    %374 = arith.index_cast %373 : i32 to index
    %c0_171 = arith.constant 0 : index
    %375 = vector.load %arg5[%374, %c0_171] : memref<64x128xf32, #tpu.memory_space<vmem>>, vector<8x128xf32>
    %cst_172 = arith.constant 0.000000e+00 : f32
    %376 = vector.broadcast %cst_172 : f32 to vector<8x128xf32>
    %377 = arith.subf %376, %365 : vector<8x128xf32>
    %378 = arith.addf %377, %369 : vector<8x128xf32>
    %cst_173 = arith.constant 1.000000e-01 : f32
    %379 = vector.broadcast %cst_173 : f32 to vector<8x128xf32>
    %380 = arith.mulf %379, %378 : vector<8x128xf32>
    %381 = arith.addf %365, %380 : vector<8x128xf32>
    %cst_174 = arith.constant 2.000000e-01 : f32
    %382 = vector.broadcast %cst_174 : f32 to vector<8x128xf32>
    %383 = arith.mulf %382, %369 : vector<8x128xf32>
    %384 = arith.subf %369, %383 : vector<8x128xf32>
    %385 = arith.addf %384, %375 : vector<8x128xf32>
    %386 = arith.index_cast %373 : i32 to index
    %c0_175 = arith.constant 0 : index
    %387 = vector.load %arg5[%386, %c0_175] : memref<64x128xf32, #tpu.memory_space<vmem>>, vector<8x128xf32>
    tpu.vector_store %arg5[%386, %c0_175], %381 {strides = array<i32>} : memref<64x128xf32, #tpu.memory_space<vmem>>, vector<8x128xf32>,
    %c8_i32_176 = arith.constant 8 : i32
    %c0_177 = arith.constant 0 : index
    %c0_178 = arith.constant 0 : index
    %388 = vector.load %arg9[%c0_177, %c0_178] : memref<8x128xf32, #tpu.memory_space<vmem>>, vector<8x128xf32>
    tpu.vector_store %arg9[%c0_177, %c0_178], %381 {strides = array<i32>} : memref<8x128xf32, #tpu.memory_space<vmem>>, vector<8x128xf32>,
    %c0_179 = arith.constant 0 : index
    %c0_180 = arith.constant 0 : index
    %389 = vector.load %arg10[%c0_179, %c0_180] : memref<8x128xf32, #tpu.memory_space<vmem>>, vector<8x128xf32>
    tpu.vector_store %arg10[%c0_179, %c0_180], %385 {strides = array<i32>} : memref<8x128xf32, #tpu.memory_space<vmem>>, vector<8x128xf32>,
    return
  }
  func.func @transform_0(%arg0: i32) -> (i32, i32) {
    %c0_i32 = arith.constant 0 : i32
    %c0_i32_0 = arith.constant 0 : i32
    return %arg0, %c0_i32 : i32, i32
  }
  func.func @transform_1(%arg0: i32) -> (i32, i32) {
    %c0_i32 = arith.constant 0 : i32
    %c0_i32_0 = arith.constant 0 : i32
    %c0_i32_1 = arith.constant 0 : i32
    return %c0_i32, %c0_i32_0 : i32, i32
  }
  func.func @transform_2(%arg0: i32) -> (i32, i32) {
    %c0_i32 = arith.constant 0 : i32
    %c0_i32_0 = arith.constant 0 : i32
    %c0_i32_1 = arith.constant 0 : i32
    return %c0_i32, %c0_i32_0 : i32, i32
  }
  func.func @transform_3(%arg0: i32) -> (i32, i32) {
    %c0_i32 = arith.constant 0 : i32
    %c0_i32_0 = arith.constant 0 : i32
    %c0_i32_1 = arith.constant 0 : i32
    return %c0_i32, %c0_i32_0 : i32, i32
  }
  func.func @transform_4(%arg0: i32) -> (i32, i32) {
    %c0_i32 = arith.constant 0 : i32
    %c0_i32_0 = arith.constant 0 : i32
    return %arg0, %c0_i32 : i32, i32
  }
}

</mosaic_0001>

<bundles_post_ra>
// kernel: tpu_custom_call.1
= control target key start
LH: loop header
LB: loop body
LE: loop exit
PB: predicated region body
PF: predicated region fallthrough
CT: control target
= control target key end

     0   :  { %9 = vsyncpa [#allocation10], 0  ;;  %s1806_s0 = inlined_call_operand.vmem [shape: f32[64,64], index: 0, kind: input, shape index: {}]   ;;  %s1807_s1 = inlined_call_operand.vmem [shape: f32[64,32], index: 1, kind: input, shape index: {}]   ;;  %s1808_s2 = inlined_call_operand.vmem [shape: f32[32,32], index: 2, kind: input, shape index: {}]   ;;  %s1809_s3 = inlined_call_operand.hbm [shape: f32[32,128], index: 3, kind: input, shape index: {}]   ;;  %s1810_s4 = inlined_call_operand.hbm [shape: f32[64,128], index: 4, kind: output, shape index: {}]  }
   0x1   :  { %10 = vsyncpa [#allocation11], 0  ;;  %s1569_s15 = smov [#allocation9]   ;;  %s1521_s19 = scalar_lea.hbm %s1809_s3, 512 }
   0x2   :  { %s22_s16 = sshll.u32 %s1569_s15, 4  ;;  %p1522_p0 = scmp.ne.s32.totalorder %s1809_s3, %s1521_s19  ;;  %s23_s16 = int_to_ptr.vmem [resolvable:$true] %s22_s16 }
   0x3   :  { %p1525_p1 = scmp.lt.u32.totalorder %s1521_s19, %s1809_s3 }
   0x5   :  { %p1527_p2 = pnand %p1525_p1, %p1522_p0 }
   0x7   :  { %1530 = shalt.err (!%p1527_p2)
}
   0x8   :  { %s1531_s24 = scalar_lea.vmem %s23_s16, 512  ;;  %p1536_p4 = scmp.lt.s32.totalorder %s23_s16, %s23_s16 }
   0x9   :  { %p1532_p3 = scmp.ne.s32.totalorder %s23_s16, %s1531_s24  ;;  %p1537_p5 = scmp.lt.s32.totalorder %s1531_s24, %s1531_s24 }
   0xb   :  { %p1538_p6 = por %p1537_p5, %p1536_p4 }
   0xd   :  { %p1539_p7 = pnand %p1538_p6, %p1532_p3 }
   0xf   :  { %1542 = shalt.err (!%p1539_p7)
}
  0x10   :  { %s1570_s25 = smov 128   ;;  %s1571_s26 = smov 8  }
  0x11   :  { %28 = dma.hbm_to_vmem [thread:$0]  %s1809_s3, 512, %s23_s16, [#allocation10], %s1570_s25, %s1570_s25, %s1571_s26  }
  0x12   :  { %1565 = dma.done.wait [#allocation10], 512  }
  0x13   :  { %1566 = vsyncadd [#allocation10], 4294966784  ;;  %vm36_vm0 = vcmask 261120   ;;  %v1572_v0 = vmov 0.0|0.0   ;;  %vm1573_vm1 = vmmov 0   ;;  %v1574_v1 = vmov 0.0  }
  0x14   :  { %1464 = vmatprep.subr.bf16.mxu1 %v1572_v0  ;;  %1353 = vmatprep.mubr.msk.f32.mxu1 %vm1573_vm1, %v1574_v1  ;;  %1108 = vst [vmem:[#allocation12] sm:$0xff] %v1574_v1  ;;  %37 = vst.msk [vmem:[#allocation2] sm:$0xff] %vm36_vm0, %v1574_v1  ;;  %v50_v2 = vld [vmem:[%s1807_s1] sm:$0xff]  ;;  %v51_v3 = vld [vmem:[%s1807_s1 + $0x8] sm:$0xff]  ;;  %vm58_vm2 = vcmask 523264  }
  0x15   :  { %38 = vst.msk [vmem:[#allocation3] sm:$0xff] %vm36_vm0, %v1574_v1  ;;  %39 = vst.msk [vmem:[#allocation4] sm:$0xff] %vm36_vm0, %v1574_v1  ;;  %v52_v4 = vld [vmem:[%s1807_s1 + $0x10] sm:$0xff]  ;;  %v1442_v5 = vpack.c.bf16 %v51_v3, %v50_v2  ;;  %v53_v6 = vld [vmem:[%s1807_s1 + $0x18] sm:$0xff] }
  0x16   :  { %v1446_v7 = vpack.c.bf16 %v53_v6, %v52_v4  ;;  %v54_v8 = vld [vmem:[%s1807_s1 + $0x20] sm:$0xff]  ;;  %v55_v9 = vld [vmem:[%s1807_s1 + $0x28] sm:$0xff]  ;;  %v199_v15 = vld [vmem:[%s1808_s2 + $0x10] sm:$0xff] }
  0x17   :  { %v42_v10 = vld [vmem:[%s1806_s0] sm:$0xff]  ;;  %1443 = vmatprep.subr.bf16.mxu0 %v1442_v5  ;;  %v198_v12 = vld [vmem:[%s1808_s2 + $0x8] sm:$0xff]  ;;  %v1450_v14 = vpack.c.bf16 %v55_v9, %v54_v8  ;;  %v200_v16 = vld [vmem:[%s1808_s2 + $0x18] sm:$0xff] }
  0x18   :  { %1322 = vmatprep.mubr.msk.f32.mxu0 %vm58_vm2, %v42_v10  ;;  %v197_v11 = vld [vmem:[%s1808_s2] sm:$0xff]  ;;  %1445 = vmatpush3.bf16.msra.mxu0 %v1442_v5  ;;  %v56_v17 = vld [vmem:[%s1807_s1 + $0x30] sm:$0xff]  ;;  %v57_v18 = vld [vmem:[%s1807_s1 + $0x38] sm:$0xff]  ;;  %v1672_v21 = vpack.c.bf16 %v200_v16, %v199_v15 }
  0x19   :  { %v1654_v13 = vpack.c.bf16 %v198_v12, %v197_v11  ;;  %1447 = vmatprep.subr.bf16.mxu0 %v1446_v7  ;;  %v1454_v23 = vpack.c.bf16 %v57_v18, %v56_v17  ;;  %v43_v27 = vld [vmem:[%s1806_s0 + $0x8] sm:$0xff]  ;;  %v44_v29 = vld [vmem:[%s1806_s0 + $0x10] sm:$0xff]  ;;  %v45_v31 = vld [vmem:[%s1806_s0 + $0x18] sm:$0xff] }
  0x1a   :  { %v46_v33 = vld [vmem:[%s1806_s0 + $0x20] sm:$0xff]  ;;  %v47_v35 = vld [vmem:[%s1806_s0 + $0x28] sm:$0xff]  ;;  %v48_v36 = vld [vmem:[%s1806_s0 + $0x30] sm:$0xff] }
  0x1b   :  { %1466 = vmatpush3.bf16.msra.mxu1 %v1654_v13  ;;  %v49_v37 = vld [vmem:[%s1806_s0 + $0x38] sm:$0xff]  ;;  %v201_v38 = vld [vmem:[#allocation2] sm:$0xff]  ;;  %s1575_s0 = smov [#allocation12]  }
  0x1c   :  { %1467 = vmatprep.subr.bf16.mxu1 %v1572_v0  ;;  %v202_v19 = vld [vmem:[#allocation3] sm:$0xff]  ;;  %v1670_v20 = vld [vmem:[#allocation4] sm:$0xff]  ;;  %1449 = vmatpush3.bf16.msra.mxu0 %v1446_v7  ;;  %s1186_s15 = sshll.u32 %s1575_s0, 4  ;;  %s1187_s15 = int_to_ptr.vmem [resolvable:$true] %s1186_s15 }
  0x1d   :  { %v204_v22 = vsub.f32 0.0, %v202_v19  ;;  %1451 = vmatprep.subr.bf16.mxu0 %v1450_v14  ;;  %v208_v47 = vmul.f32 0.2, %v1670_v20  ;;  %s1543_s16 = scalar_lea.vmem %s1187_s15, 1024  ;;  %p1548_p9 = scmp.lt.s32.totalorder %s1187_s15, %s1187_s15 }
  0x1e   :  { %p1544_p8 = scmp.ne.s32.totalorder %s1187_s15, %s1543_s16  ;;  %p1549_p10 = scmp.lt.s32.totalorder %s1543_s16, %s1543_s16 }
  0x1f   :  { %1469 = vmatpush3.bf16.msra.mxu1 %v1672_v21  ;;  %v205_v24 = vadd.f32 %v204_v22, %v1670_v20  ;;  %v209_v50 = vsub.f32 %v1670_v20, %v208_v47 }
  0x20   :  { %1470 = vmatprep.subr.bf16.mxu1 %v1572_v0  ;;  %1453 = vmatpush3.bf16.msra.mxu0 %v1450_v14  ;;  %p1550_p11 = por %p1549_p10, %p1548_p9 }
  0x21   :  { %v206_v25 = vmul.f32 0.1, %v205_v24  ;;  %1455 = vmatprep.subr.bf16.mxu0 %v1454_v23 }
  0x22   :  { %p1551_p12 = pnand %p1550_p11, %p1544_p8 }
  0x23   :  { %v207_v26 = vadd.f32 %v206_v25, %v202_v19 }
  0x24   :  { %1457 = vmatpush3.bf16.msra.mxu0 %v1454_v23 }
  0x25   :  { %v1206_v28 = vadd.f32 -0.5, %v207_v26  ;;  %1458 = vmatprep.subr.bf16.mxu0 %v1572_v0 }
  0x27   :  { %vm211_vm3 = vcmp.gt.f32.partialorder %v1206_v28, 0.0  ;;  %1323 = vmatmul.mubr.msk.f32.vlgmr.msra.gmra.mrb[0].mxu0 %vm58_vm2, %v43_v27 }
  0x28   :  { %v1207_v30 = vsel %vm211_vm3, 1.0, %v1574_v1  ;;  %1460 = vmatpush3.bf16.msra.mxu0 %v1654_v13  ;;  %1325 = vmatprep.mubr.msk.f32.mxu0 %vm58_vm2, %v44_v29 }
  0x29   :  { %v214_v32 = vsub.f32 1.0, %v1207_v30  ;;  %294 = vst.msk [vmem:[#allocation8] sm:$0xff] %vm36_vm0, %v1207_v30  ;;  %1461 = vmatprep.subr.bf16.mxu0 %v1572_v0  ;;  %1354 = vmatmul.mubr.msk.f32.vlgmr.msra.gmra.mrb[0].mxu1 %vm36_vm0, %v1207_v30  ;;  %v216_v39 = vmul.f32 0.0, %v1207_v30 }
  0x2a   :  { %1472 = vmatpush3.bf16.msra.mxu1 %v1654_v13  ;;  %1364 = vmatprep.mubr.msk.f32.mxu1 %vm1573_vm1, %v1574_v1 }
  0x2b   :  { %v215_v34 = vmul.f32 %v214_v32, %v207_v26  ;;  %1326 = vmatmul.mubr.msk.f32.gmra.mrb[2].mxu0 %vm58_vm2, %v45_v31  ;;  %1473 = vmatprep.subr.bf16.mxu1 %v1572_v0 }
  0x2c   :  { %1328 = vmatprep.mubr.msk.f32.mxu0 %vm58_vm2, %v46_v33  ;;  %1463 = vmatpush3.bf16.msra.mxu0 %v1672_v21 }
  0x2d   :  { %1476 = vmatprep.subr.bf16.mxu0 %v1572_v0  ;;  %v217_v40 = vadd.f32 %v216_v39, %v215_v34 }
  0x2e   :  { %1475 = vmatpush3.bf16.msra.mxu1 %v1672_v21 }
  0x2f   :  { %1329 = vmatmul.mubr.msk.f32.gmra.mrb[4].mxu0 %vm58_vm2, %v47_v35  ;;  %1482 = vmatprep.subr.bf16.mxu1 %v1572_v0  ;;  %v295_v55 = vsub.f32 0.0, %v217_v40 }
  0x30   :  { %1331 = vmatprep.mubr.msk.f32.mxu0 %vm58_vm2, %v48_v36 }
  0x33   :  { %1332 = vmatmul.mubr.msk.f32.gmra.mrb[6].mxu0 %vm58_vm2, %v49_v37 }
  0x34   :  { %1342 = vmatprep.mubr.msk.f32.mxu0 %vm1573_vm1, %v1574_v1 }
  0x37   :  { %1343 = vmatmul.mubr.msk.f32.vlgmr.msra.gmra.mrb[8].mxu0 %vm36_vm0, %v201_v38 }
  0x38   :  { %1478 = vmatpush3.bf16.msra.mxu0 %v1654_v13  ;;  %1375 = vmatprep.mubr.msk.f32.mxu0 %vm1573_vm1, %v1574_v1 }
  0x39   :  { %1479 = vmatprep.subr.bf16.mxu0 %v1572_v0 }
  0x3c   :  { %1481 = vmatpush3.bf16.msra.mxu0 %v1672_v21 }
  0x3d   :  { %1488 = vmatprep.subr.bf16.mxu0 %v1572_v0 }
  0xfa   :  { %v1324_v41 = vpop.f32.mrb[0].mxu0 }
  0xfb   :  { %190 = vst.msk [vmem:[#allocation7 + $0x8] sm:$0xff] %vm36_vm0, %v1324_v41  ;;  %v149_v42 = vpop.f32.mrb[1].mxu0 }
  0xfc   :  { %189 = vst.msk [vmem:[#allocation7] sm:$0xff] %vm36_vm0, %v149_v42  ;;  %v381_v43 = vpop.f32.mrb[0].mxu1 }
  0xfd   :  { %v1355_v44 = vpop.f32.mrb[1].mxu1 }
  0xfe   :  { %v1327_v45 = vpop.f32.mrb[2].mxu0 }
  0xff   :  { %192 = vst.msk [vmem:[#allocation7 + $0x18] sm:$0xff] %vm36_vm0, %v1327_v45  ;;  %v159_v46 = vpop.f32.mrb[3].mxu0 }
 0x100   :  { %191 = vst.msk [vmem:[#allocation7 + $0x10] sm:$0xff] %vm36_vm0, %v159_v46 }
 0x102   :  { %v1330_v48 = vpop.f32.mrb[4].mxu0  ;;  %v310_v63 = vld [vmem:[#allocation7 + $0x8] sm:$0xff] }
 0x103   :  { %194 = vst.msk [vmem:[#allocation7 + $0x28] sm:$0xff] %vm36_vm0, %v1330_v48  ;;  %v169_v49 = vpop.f32.mrb[5].mxu0  ;;  %v218_v52 = vld [vmem:[#allocation7] sm:$0xff] }
 0x104   :  { %193 = vst.msk [vmem:[#allocation7 + $0x20] sm:$0xff] %vm36_vm0, %v169_v49  ;;  %v219_v54 = vadd.f32 %v218_v52, %v209_v50 }
 0x106   :  { %v1333_v51 = vpop.f32.mrb[6].mxu0  ;;  %v496_v41 = vld [vmem:[#allocation7 + $0x18] sm:$0xff] }
 0x107   :  { %196 = vst.msk [vmem:[#allocation7 + $0x38] sm:$0xff] %vm36_vm0, %v1333_v51  ;;  %v179_v53 = vpop.f32.mrb[7].mxu0  ;;  %v403_v25 = vld [vmem:[#allocation7 + $0x10] sm:$0xff] }
 0x108   :  { %195 = vst.msk [vmem:[#allocation7 + $0x30] sm:$0xff] %vm36_vm0, %v179_v53 }
 0x10a   :  { %v289_v56 = vpop.f32.mrb[8].mxu0 }
 0x10b   :  { %v293_v57 = vadd.f32 %v289_v56, %v219_v54  ;;  %v1344_v58 = vpop.f32.mrb[9].mxu0 }
 0x10c   :  { %v958_v58 = vld [vmem:[#allocation9 + $0x8] sm:$0xff] }
 0x10d   :  { %v296_v59 = vadd.f32 %v295_v55, %v293_v57  ;;  %v299_v60 = vmul.f32 0.2, %v293_v57 }
 0x10f   :  { %v297_v61 = vmul.f32 0.1, %v296_v59  ;;  %v300_v62 = vsub.f32 %v293_v57, %v299_v60  ;;  %v957_v57 = vld [vmem:[#allocation9] sm:$0xff] }
 0x110   :  { %v1506_v59 = vpack.c.bf16 %v958_v58, %v957_v57 }
 0x111   :  { %v298_v2 = vadd.f32 %v297_v61, %v217_v40  ;;  %v311_v3 = vadd.f32 %v310_v63, %v300_v62  ;;  %v589_v62 = vld [vmem:[#allocation7 + $0x20] sm:$0xff] }
 0x113   :  { %v1209_v4 = vadd.f32 -0.5, %v298_v2  ;;  %v385_v5 = vadd.f32 %v381_v43, %v311_v3 }
 0x115   :  { %vm302_vm4 = vcmp.gt.f32.partialorder %v1209_v4, 0.0  ;;  %v392_v23 = vmul.f32 0.2, %v385_v5 }
 0x116   :  { %v1210_v6 = vsel %vm302_vm4, 1.0, %v1574_v1 }
 0x117   :  { %v305_v7 = vsub.f32 1.0, %v1210_v6  ;;  %387 = vst.msk [vmem:[#allocation8 + $0x8] sm:$0xff] %vm36_vm0, %v1210_v6  ;;  %1365 = vmatmul.mubr.msk.f32.vlgmr.msra.gmra.mrb[2].mxu1 %vm36_vm0, %v1210_v6  ;;  %v307_v9 = vmul.f32 0.0, %v1210_v6  ;;  %v393_v24 = vsub.f32 %v385_v5, %v392_v23 }
 0x118   :  { %1484 = vmatpush3.bf16.msra.mxu1 %v1654_v13  ;;  %1386 = vmatprep.mubr.msk.f32.mxu1 %vm1573_vm1, %v1574_v1 }
 0x119   :  { %v306_v8 = vmul.f32 %v305_v7, %v298_v2  ;;  %1485 = vmatprep.subr.bf16.mxu1 %v1572_v0  ;;  %v404_v26 = vadd.f32 %v403_v25, %v393_v24 }
 0x11b   :  { %v308_v10 = vadd.f32 %v307_v9, %v306_v8  ;;  %v959_v8 = vld [vmem:[#allocation9 + $0x10] sm:$0xff] }
 0x11c   :  { %1487 = vmatpush3.bf16.msra.mxu1 %v1672_v21 }
 0x11d   :  { %v388_v11 = vsub.f32 0.0, %v308_v10  ;;  %1494 = vmatprep.subr.bf16.mxu1 %v1572_v0 }
 0x11f   :  { %v389_v12 = vadd.f32 %v388_v11, %v385_v5  ;;  %v949_v11 = vld [vmem:[#allocation8] sm:$0xff] }
 0x121   :  { %v390_v14 = vmul.f32 0.1, %v389_v12 }
 0x123   :  { %v391_v15 = vadd.f32 %v390_v14, %v308_v10 }
 0x125   :  { %v1212_v16 = vadd.f32 -0.5, %v391_v15 }
 0x127   :  { %vm395_vm5 = vcmp.gt.f32.partialorder %v1212_v16, 0.0 }
 0x128   :  { %v1213_v17 = vsel %vm395_vm5, 1.0, %v1574_v1 }
 0x129   :  { %v398_v18 = vsub.f32 1.0, %v1213_v17  ;;  %480 = vst.msk [vmem:[#allocation8 + $0x10] sm:$0xff] %vm36_vm0, %v1213_v17  ;;  %1376 = vmatmul.mubr.msk.f32.vlgmr.msra.gmra.mrb[10].mxu0 %vm36_vm0, %v1213_v17  ;;  %v400_v19 = vmul.f32 0.0, %v1213_v17 }
 0x12a   :  { %1490 = vmatpush3.bf16.msra.mxu0 %v1654_v13  ;;  %1397 = vmatprep.mubr.msk.f32.mxu0 %vm1573_vm1, %v1574_v1 }
 0x12b   :  { %v399_v20 = vmul.f32 %v398_v18, %v391_v15  ;;  %1491 = vmatprep.subr.bf16.mxu0 %v1572_v0  ;;  %v682_v18 = vld [vmem:[#allocation7 + $0x28] sm:$0xff] }
 0x12d   :  { %v401_v22 = vadd.f32 %v400_v19, %v399_v20 }
 0x12e   :  { %1493 = vmatpush3.bf16.msra.mxu0 %v1672_v21 }
 0x12f   :  { %1500 = vmatprep.subr.bf16.mxu0 %v1572_v0  ;;  %v481_v29 = vsub.f32 0.0, %v401_v22 }
 0x1ea   :  { %v474_v27 = vpop.f32.mrb[2].mxu1 }
 0x1eb   :  { %v478_v28 = vadd.f32 %v474_v27, %v404_v26  ;;  %v1366_v30 = vpop.f32.mrb[3].mxu1  ;;  %v950_v26 = vld [vmem:[#allocation8 + $0x8] sm:$0xff] }
 0x1ed   :  { %v482_v31 = vadd.f32 %v481_v29, %v478_v28  ;;  %v485_v34 = vmul.f32 0.2, %v478_v28 }
 0x1ef   :  { %v483_v32 = vmul.f32 0.1, %v482_v31  ;;  %v486_v38 = vsub.f32 %v478_v28, %v485_v34  ;;  %v951_v28 = vld [vmem:[#allocation8 + $0x10] sm:$0xff] }
 0x1f1   :  { %v484_v33 = vadd.f32 %v483_v32, %v401_v22  ;;  %v497_v43 = vadd.f32 %v496_v41, %v486_v38 }
 0x1f3   :  { %v1215_v35 = vadd.f32 -0.5, %v484_v33 }
 0x1f5   :  { %vm488_vm6 = vcmp.gt.f32.partialorder %v1215_v35, 0.0 }
 0x1f6   :  { %v1216_v36 = vsel %vm488_vm6, 1.0, %v1574_v1 }
 0x1f7   :  { %v491_v37 = vsub.f32 1.0, %v1216_v36  ;;  %573 = vst.msk [vmem:[#allocation8 + $0x18] sm:$0xff] %vm36_vm0, %v1216_v36  ;;  %1387 = vmatmul.mubr.msk.f32.vlgmr.msra.gmra.mrb[4].mxu1 %vm36_vm0, %v1216_v36  ;;  %v493_v39 = vmul.f32 0.0, %v1216_v36 }
 0x1f8   :  { %1496 = vmatpush3.bf16.msra.mxu1 %v1654_v13  ;;  %1408 = vmatprep.mubr.msk.f32.mxu1 %vm1573_vm1, %v1574_v1 }
 0x1f9   :  { %v492_v40 = vmul.f32 %v491_v37, %v484_v33  ;;  %1497 = vmatprep.subr.bf16.mxu1 %v1572_v0 }
 0x1fb   :  { %v494_v42 = vadd.f32 %v493_v39, %v492_v40 }
 0x1fc   :  { %v567_v44 = vpop.f32.mrb[10].mxu0  ;;  %1499 = vmatpush3.bf16.msra.mxu1 %v1672_v21 }
 0x1fd   :  { %v571_v45 = vadd.f32 %v567_v44, %v497_v43  ;;  %v574_v46 = vsub.f32 0.0, %v494_v42  ;;  %v1377_v47 = vpop.f32.mrb[11].mxu0  ;;  %1507 = vmatprep.subr.bf16.mxu1 %v1506_v59  ;;  %v775_v43 = vld [vmem:[#allocation7 + $0x30] sm:$0xff] }
 0x1fe   :  { %v952_v30 = vld [vmem:[#allocation8 + $0x18] sm:$0xff] }
 0x1ff   :  { %v575_v48 = vadd.f32 %v574_v46, %v571_v45  ;;  %v578_v60 = vmul.f32 0.2, %v571_v45 }
 0x201   :  { %v576_v49 = vmul.f32 0.1, %v575_v48  ;;  %v579_v61 = vsub.f32 %v571_v45, %v578_v60 }
 0x203   :  { %v577_v50 = vadd.f32 %v576_v49, %v494_v42  ;;  %v590_v63 = vadd.f32 %v589_v62, %v579_v61 }
 0x205   :  { %v1218_v51 = vadd.f32 -0.5, %v577_v50 }
 0x207   :  { %vm581_vm7 = vcmp.gt.f32.partialorder %v1218_v51, 0.0 }
 0x208   :  { %v1219_v52 = vsel %vm581_vm7, 1.0, %v1574_v1 }
 0x209   :  { %v584_v53 = vsub.f32 1.0, %v1219_v52  ;;  %666 = vst.msk [vmem:[#allocation8 + $0x20] sm:$0xff] %vm36_vm0, %v1219_v52  ;;  %1398 = vmatmul.mubr.msk.f32.vlgmr.msra.gmra.mrb[12].mxu0 %vm36_vm0, %v1219_v52  ;;  %v586_v54 = vmul.f32 0.0, %v1219_v52 }
 0x20a   :  { %1502 = vmatpush3.bf16.msra.mxu0 %v1654_v13  ;;  %1419 = vmatprep.mubr.msk.f32.mxu0 %vm1573_vm1, %v1574_v1 }
 0x20b   :  { %v585_v55 = vmul.f32 %v584_v53, %v577_v50  ;;  %1503 = vmatprep.subr.bf16.mxu0 %v1572_v0  ;;  %v960_v0 = vld [vmem:[#allocation9 + $0x18] sm:$0xff] }
 0x20d   :  { %v587_v56 = vadd.f32 %v586_v54, %v585_v55 }
 0x20e   :  { %1505 = vmatpush3.bf16.msra.mxu0 %v1672_v21  ;;  %v1510_v21 = vpack.c.bf16 %v960_v0, %v959_v8  ;;  %v868_v8 = vld [vmem:[#allocation7 + $0x38] sm:$0xff] }
 0x20f   :  { %v667_v3 = vsub.f32 0.0, %v587_v56 }
 0x210   :  { %v953_v32 = vld [vmem:[#allocation8 + $0x20] sm:$0xff] }
 0x2ca   :  { %v660_v2 = vpop.f32.mrb[4].mxu1 }
 0x2cb   :  { %v664_v13 = vadd.f32 %v660_v2, %v590_v63  ;;  %v1388_v4 = vpop.f32.mrb[5].mxu1 }
 0x2cd   :  { %v668_v5 = vadd.f32 %v667_v3, %v664_v13  ;;  %v671_v9 = vmul.f32 0.2, %v664_v13 }
 0x2cf   :  { %v669_v6 = vmul.f32 0.1, %v668_v5  ;;  %v672_v15 = vsub.f32 %v664_v13, %v671_v9 }
 0x2d1   :  { %v670_v7 = vadd.f32 %v669_v6, %v587_v56  ;;  %v683_v20 = vadd.f32 %v682_v18, %v672_v15 }
 0x2d3   :  { %v1221_v10 = vadd.f32 -0.5, %v670_v7 }
 0x2d5   :  { %vm674_vm8 = vcmp.gt.f32.partialorder %v1221_v10, 0.0 }
 0x2d6   :  { %v1222_v12 = vsel %vm674_vm8, 1.0, %v1574_v1 }
 0x2d7   :  { %v677_v14 = vsub.f32 1.0, %v1222_v12  ;;  %759 = vst.msk [vmem:[#allocation8 + $0x28] sm:$0xff] %vm36_vm0, %v1222_v12  ;;  %1409 = vmatmul.mubr.msk.f32.vlgmr.msra.gmra.mrb[6].mxu1 %vm36_vm0, %v1222_v12  ;;  %v679_v16 = vmul.f32 0.0, %v1222_v12 }
 0x2d8   :  { %1509 = vmatpush3.bf16.msra.mxu1 %v1506_v59  ;;  %1430 = vmatprep.mubr.msk.f32.mxu1 %vm36_vm0, %v949_v11 }
 0x2d9   :  { %1511 = vmatprep.subr.bf16.mxu1 %v1510_v21  ;;  %v678_v17 = vmul.f32 %v677_v14, %v670_v7 }
 0x2db   :  { %v680_v19 = vadd.f32 %v679_v16, %v678_v17 }
 0x2dc   :  { %1513 = vmatpush3.bf16.msra.mxu1 %v1510_v21  ;;  %v753_v22 = vpop.f32.mrb[12].mxu0 }
 0x2dd   :  { %v757_v23 = vadd.f32 %v753_v22, %v683_v20  ;;  %v760_v24 = vsub.f32 0.0, %v680_v19  ;;  %v1399_v25 = vpop.f32.mrb[13].mxu0 }
 0x2de   :  { %v954_v34 = vld [vmem:[#allocation8 + $0x28] sm:$0xff] }
 0x2df   :  { %v761_v27 = vadd.f32 %v760_v24, %v757_v23  ;;  %1431 = vmatmul.mubr.msk.f32.vlgmr.msra.gmra.mrb[8].mxu1 %vm36_vm0, %v950_v26  ;;  %v764_v41 = vmul.f32 0.2, %v757_v23 }
 0x2e0   :  { %1433 = vmatprep.mubr.msk.f32.mxu1 %vm36_vm0, %v951_v28 }
 0x2e1   :  { %v762_v29 = vmul.f32 0.1, %v761_v27  ;;  %v765_v42 = vsub.f32 %v757_v23, %v764_v41 }
 0x2e3   :  { %v763_v31 = vadd.f32 %v762_v29, %v680_v19  ;;  %1434 = vmatmul.mubr.msk.f32.gmra.mrb[10].mxu1 %vm36_vm0, %v952_v30  ;;  %v776_v44 = vadd.f32 %v775_v43, %v765_v42 }
 0x2e4   :  { %1436 = vmatprep.mubr.msk.f32.mxu1 %vm36_vm0, %v953_v32 }
 0x2e5   :  { %v1224_v33 = vadd.f32 -0.5, %v763_v31 }
 0x2e7   :  { %1437 = vmatmul.mubr.msk.f32.gmra.mrb[12].mxu1 %vm36_vm0, %v954_v34  ;;  %vm767_vm9 = vcmp.gt.f32.partialorder %v1224_v33, 0.0 }
 0x2e8   :  { %v1225_v35 = vsel %vm767_vm9, 1.0, %v1574_v1 }
 0x2e9   :  { %v770_v36 = vsub.f32 1.0, %v1225_v35  ;;  %852 = vst.msk [vmem:[#allocation8 + $0x30] sm:$0xff] %vm36_vm0, %v1225_v35  ;;  %1420 = vmatmul.mubr.msk.f32.vlgmr.msra.gmra.mrb[14].mxu0 %vm36_vm0, %v1225_v35  ;;  %v772_v37 = vmul.f32 0.0, %v1225_v35 }
 0x2eb   :  { %v771_v38 = vmul.f32 %v770_v36, %v763_v31 }
 0x2ed   :  { %v773_v39 = vadd.f32 %v772_v37, %v771_v38 }
 0x2ef   :  { %v853_v47 = vsub.f32 0.0, %v773_v39 }
 0x2f0   :  { %v955_v40 = vld [vmem:[#allocation8 + $0x30] sm:$0xff] }
 0x2f1   :  { %1439 = vmatprep.mubr.msk.f32.mxu1 %vm36_vm0, %v955_v40 }
 0x3aa   :  { %v846_v45 = vpop.f32.mrb[6].mxu1 }
 0x3ab   :  { %v850_v46 = vadd.f32 %v846_v45, %v776_v44  ;;  %v1410_v48 = vpop.f32.mrb[7].mxu1 }
 0x3ad   :  { %v854_v49 = vadd.f32 %v853_v47, %v850_v46  ;;  %v857_v53 = vmul.f32 0.2, %v850_v46 }
 0x3af   :  { %v855_v50 = vmul.f32 0.1, %v854_v49  ;;  %v858_v63 = vsub.f32 %v850_v46, %v857_v53 }
 0x3b1   :  { %v856_v51 = vadd.f32 %v855_v50, %v773_v39  ;;  %v869_v9 = vadd.f32 %v868_v8, %v858_v63 }
 0x3b2   :  { %v1432_v52 = vpop.f32.mrb[8].mxu1 }
 0x3b3   :  { %v1227_v54 = vadd.f32 -0.5, %v856_v51  ;;  %v1051_v55 = vpop.f32.mrb[9].mxu1 }
 0x3b4   :  { %v1113_v56 = vmul.f32 0.1, %v1051_v55  ;;  %v1115_v57 = vmul.f32 0.2, %v1051_v55 }
 0x3b5   :  { %vm860_vm10 = vcmp.gt.f32.partialorder %v1227_v54, 0.0 }
 0x3b6   :  { %v1228_v58 = vsel %vm860_vm10, 1.0, %v1574_v1  ;;  %v1116_v59 = vsub.f32 %v1051_v55, %v1115_v57  ;;  %1118 = vst [vmem:[#allocation12 + $0x8] sm:$0xff] %v1113_v56  ;;  %v1435_v60 = vpop.f32.mrb[10].mxu1  ;;  %v1121_v13 = vsub.f32 0.0, %v1113_v56 }
 0x3b7   :  { %v863_v61 = vsub.f32 1.0, %v1228_v58  ;;  %945 = vst.msk [vmem:[#allocation8 + $0x38] sm:$0xff] %vm36_vm0, %v1228_v58  ;;  %946 = vst.msk [vmem:[#allocation2] sm:$0xff] %vm36_vm0, %v1228_v58  ;;  %v1061_v62 = vpop.f32.mrb[11].mxu1  ;;  %v865_v4 = vmul.f32 0.0, %v1228_v58 }
 0x3b8   :  { %v1117_v2 = vadd.f32 %v1432_v52, %v1116_v59 }
 0x3b9   :  { %v864_v3 = vmul.f32 %v863_v61, %v856_v51 }
 0x3ba   :  { %v1122_v5 = vadd.f32 %v1121_v13, %v1117_v2  ;;  %v1125_v6 = vmul.f32 0.2, %v1117_v2  ;;  %v1438_v7 = vpop.f32.mrb[12].mxu1 }
 0x3bb   :  { %v866_v0 = vadd.f32 %v865_v4, %v864_v3  ;;  %v1071_v1 = vpop.f32.mrb[13].mxu1 }
 0x3bc   :  { %v1123_v10 = vmul.f32 0.1, %v1122_v5  ;;  %v1126_v21 = vsub.f32 %v1117_v2, %v1125_v6  ;;  %v939_v11 = vpop.f32.mrb[14].mxu0 }
 0x3bd   :  { %947 = vst.msk [vmem:[#allocation3] sm:$0xff] %vm36_vm0, %v866_v0  ;;  %v943_v12 = vadd.f32 %v939_v11, %v869_v9  ;;  %v1421_v14 = vpop.f32.mrb[15].mxu0 }
 0x3be   :  { %v1124_v15 = vadd.f32 %v1123_v10, %v1113_v56  ;;  %v1127_v16 = vadd.f32 %v1126_v21, %v1061_v62  ;;  %v956_v17 = vld [vmem:[#allocation8 + $0x38] sm:$0xff] }
 0x3bf   :  { %948 = vst.msk [vmem:[#allocation4] sm:$0xff] %vm36_vm0, %v943_v12  ;;  %1440 = vmatmul.mubr.msk.f32.gmra.mrb[14].mxu1 %vm36_vm0, %v956_v17 }
 0x3c0   :  { %1128 = vst [vmem:[#allocation12 + $0x10] sm:$0xff] %v1124_v15  ;;  %v1131_v18 = vsub.f32 0.0, %v1124_v15  ;;  %v1135_v19 = vmul.f32 0.2, %v1127_v16 }
 0x3c2   :  { %v1132_v20 = vadd.f32 %v1131_v18, %v1127_v16  ;;  %v1136_v22 = vsub.f32 %v1127_v16, %v1135_v19 }
 0x3c4   :  { %v1133_v23 = vmul.f32 0.1, %v1132_v20  ;;  %v1137_v24 = vadd.f32 %v1435_v60, %v1136_v22 }
 0x3c6   :  { %v1134_v25 = vadd.f32 %v1133_v23, %v1124_v15  ;;  %v1145_v26 = vmul.f32 0.2, %v1137_v24 }
 0x3c8   :  { %1138 = vst [vmem:[#allocation12 + $0x18] sm:$0xff] %v1134_v25  ;;  %v1141_v27 = vsub.f32 0.0, %v1134_v25  ;;  %v1146_v28 = vsub.f32 %v1137_v24, %v1145_v26 }
 0x3ca   :  { %v1142_v29 = vadd.f32 %v1141_v27, %v1137_v24  ;;  %v1147_v30 = vadd.f32 %v1146_v28, %v1071_v1 }
 0x3cc   :  { %v1143_v31 = vmul.f32 0.1, %v1142_v29  ;;  %v1155_v32 = vmul.f32 0.2, %v1147_v30 }
 0x3ce   :  { %v1144_v33 = vadd.f32 %v1143_v31, %v1134_v25  ;;  %v1156_v34 = vsub.f32 %v1147_v30, %v1155_v32 }
 0x3d0   :  { %1148 = vst [vmem:[#allocation12 + $0x20] sm:$0xff] %v1144_v33  ;;  %v1151_v35 = vsub.f32 0.0, %v1144_v33  ;;  %v1157_v36 = vadd.f32 %v1438_v7, %v1156_v34 }
 0x3d2   :  { %v1152_v37 = vadd.f32 %v1151_v35, %v1147_v30  ;;  %v1165_v44 = vmul.f32 0.2, %v1157_v36 }
 0x3d4   :  { %v1153_v38 = vmul.f32 0.1, %v1152_v37  ;;  %v1166_v46 = vsub.f32 %v1157_v36, %v1165_v44 }
 0x3d6   :  { %v1154_v39 = vadd.f32 %v1153_v38, %v1144_v33 }
 0x3d8   :  { %1158 = vst [vmem:[#allocation12 + $0x28] sm:$0xff] %v1154_v39  ;;  %v1161_v40 = vsub.f32 0.0, %v1154_v39 }
 0x3da   :  { %v1162_v41 = vadd.f32 %v1161_v40, %v1157_v36 }
 0x3dc   :  { %v1163_v42 = vmul.f32 0.1, %v1162_v41 }
 0x3de   :  { %v1164_v43 = vadd.f32 %v1163_v42, %v1154_v39 }
 0x3e0   :  { %1168 = vst [vmem:[#allocation12 + $0x30] sm:$0xff] %v1164_v43  ;;  %v1171_v49 = vsub.f32 0.0, %v1164_v43 }
 0x492   :  { %v1441_v45 = vpop.f32.mrb[14].mxu1 }
 0x493   :  { %v1081_v47 = vpop.f32.mrb[15].mxu1 }
 0x494   :  { %v1167_v48 = vadd.f32 %v1166_v46, %v1081_v47 }
 0x496   :  { %v1172_v50 = vadd.f32 %v1171_v49, %v1167_v48 }
 0x498   :  { %v1173_v51 = vmul.f32 0.1, %v1172_v50 }
 0x49a   :  { %v1174_v52 = vadd.f32 %v1173_v51, %v1164_v43 }
 0x49c   :  { %1178 = vst [vmem:[#allocation12 + $0x38] sm:$0xff] %v1174_v52 }
 0x49d   :  { %1554 = shalt.err (!%p1551_p12)
}
 0x49e   :  { %s1555_s19 = scalar_lea.hbm %s1810_s4, 1024 }
 0x49f   :  { %p1556_p13 = scmp.ne.s32.totalorder %s1810_s4, %s1555_s19  ;;  %p1559_p0 = scmp.lt.u32.totalorder %s1555_s19, %s1810_s4 }
 0x4a1   :  { %p1561_p1 = pnand %p1559_p0, %p1556_p13 }
 0x4a3   :  { %1564 = shalt.err (!%p1561_p1)
}
 0x4a4   :  { %1192 = dma.vmem_to_hbm [thread:$0]  %s1187_s15, 1024, %s1810_s4, [#allocation11], %s1570_s25, %s1570_s25, %s1571_s26  }
 0x4a5   :  { %1567 = dma.done.wait [#allocation11], 1024  }
 0x4a6   :  { %1568 = vsyncadd [#allocation11], 4294966272 }
 0x4a7   :  { %1196 = vsyncpa [#allocation10], 1 }
 0x4a8   :  { %1197 = vsyncpa [#allocation11], 1 }

</bundles_post_ra>
